<compile_context>
chip_gen: v6e
topology: v6e:2x2x1
jax: 0.10.0
libtpu: 0.0.40
codegen_flags: <defaults>
</compile_context>

<pallas_src>
import functools

import jax
import jax.numpy as jnp
from jax import lax
from jax.experimental import pallas as pl
from jax.experimental.pallas import tpu as pltpu


def infercode_kernel(
    emb_ref,        # (block_n, 2*dim) bf16  -- cat(type_emb, token_emb)
    eta_ref,        # (block_n, 3)     f32   -- [eta_t, eta_l, eta_r]
    nidx_ref,       # (1, block_n)     i32   -- node_indices row (pad rows = n_nodes)
    w_fused_ref,    # (2*dim, 3*dim)   bf16  -- enc_w^T @ [w_t^T|w_l^T|w_r^T]
    b_fused_ref,    # (1, 3*dim)       f32   -- enc_b @ [w_t^T|w_l^T|w_r^T]
    bias_ref,       # (1, 1)           f32   -- SMEM scalar (bias_conv)
    alpha_ref,      # (1, dim)         f32
    tnidx_col_ref,  # (n_nodes, 1)     i32
    tnidx_row_ref,  # (1, n_nodes)     i32
    tidx_ref,       # (T, 1)           i32
    subtree_ref,    # (T, neg, dim)    f32
    logits_ref,     # out: (T, neg)    f32
    acc_ref,        # scratch: (n_nodes, dim) f32  -- node_pre accumulator
    *, n_nodes, n_groups,
):
    f32 = jnp.float32
    bf16 = jnp.bfloat16
    block_n = emb_ref.shape[0]
    dim = alpha_ref.shape[1]
    T, neg, _ = subtree_ref.shape
    step = pl.program_id(0)

    @pl.when(step == 0)
    def _():
        acc_ref[...] = jnp.zeros_like(acc_ref)

    # ---- fused encoder + tree conv: one (bn, 2*dim) @ (2*dim, 3*dim) matmul --
    h3 = jnp.dot(emb_ref[...], w_fused_ref[...],
                 preferred_element_type=f32) + b_fused_ref[...]          # (bn, 3*dim)
    eta = eta_ref[...]
    conv = (eta[:, 0:1] * h3[:, :dim]
            + eta[:, 1:2] * h3[:, dim:2 * dim]
            + eta[:, 2:3] * h3[:, 2 * dim:])                             # (bn, dim)

    # ---- scatter_add over node_indices for THIS block ------------------------
    # Pre-transposed bf16 one-hot: (n_nodes, bn) @ (bn, dim) is a natural MXU
    # contraction (no XLU transpose). Padded columns carry index == n_nodes,
    # which never matches the iota -> contribute nothing.
    node_iota = lax.broadcasted_iota(jnp.int32, (n_nodes, block_n), 0)
    m_node_t = (node_iota == nidx_ref[...]).astype(bf16)                 # (n, bn)
    acc_ref[...] += jnp.dot(m_node_t, conv.astype(bf16),
                            preferred_element_type=f32)                  # (n, dim)

    # ---- tail (last block only): softmax, code vectors, logits ---------------
    @pl.when(step == pl.num_programs(0) - 1)
    def _():
        node_emb = jnp.tanh(acc_ref[...] + bias_ref[0, 0])               # (n, dim)
        scores = jnp.sum(node_emb * alpha_ref[...], axis=-1,
                         keepdims=True)                                   # (n, 1)

        # Group one-hots in both layouts (pure VPU compares; no transposes).
        m_tree = (lax.broadcasted_iota(jnp.int32, (n_nodes, n_groups), 1)
                  == tnidx_col_ref[...])                                  # (n, G) bool
        m_tree_t = (lax.broadcasted_iota(jnp.int32, (n_groups, n_nodes), 0)
                    == tnidx_row_ref[...]).astype(f32)                    # (G, n)

        # Stable scatter-softmax: per-group max, gathered back per node.
        masked = jnp.where(m_tree, scores, -1e30)                         # (n, G)
        g_max = jnp.max(masked, axis=0, keepdims=True)                    # (1, G)
        node_gmax = jnp.sum(m_tree.astype(f32) * g_max, axis=1,
                            keepdims=True)                                 # (n, 1)
        exp_s = jnp.exp(scores - node_gmax)                                # (n, 1)

        # Scatter-sums as natural-contraction matmuls; normalize AFTER the
        # scatter with an exact divide (numerically matches per-node softmax).
        g_sum = jnp.dot(m_tree_t, exp_s, preferred_element_type=f32)       # (G, 1)
        code_sums = jnp.dot(m_tree_t, node_emb * exp_s,
                            preferred_element_type=f32)                    # (G, dim)
        safe_sum = jnp.where(g_sum > 0.0, g_sum, 1.0)   # empty group -> 0 vec
        code_vecs = code_sums / safe_sum                                   # (G, dim)

        # Gather each batch tree's code vector via a one-hot matmul.
        m_gather = (lax.broadcasted_iota(jnp.int32, (T, n_groups), 1)
                    == tidx_ref[...]).astype(f32)                          # (T, G)
        cv = jnp.dot(m_gather, code_vecs, preferred_element_type=f32)      # (T, dim)

        # logits[t, j] = <subtree[t, j, :], cv[t, :]>
        logits_ref[...] = jnp.sum(subtree_ref[...] * cv[:, None, :], axis=-1)


def infercode_forward(params, type_batch, token_batch, node_indices,
                      eta_t, eta_l, eta_r, tree_node_indices, tree_indices,
                      pn_indices, *, n_nodes, n_groups, block_n=1024):
    dim = params["embedding_type"].shape[1]
    N = type_batch.shape[0]
    T, neg = pn_indices.shape
    f32, bf16 = jnp.float32, jnp.bfloat16

    # Embedding gathers stay in plain JAX (XLA gather); dense math in Pallas.
    type_emb = jnp.take(params["embedding_type"], type_batch, axis=0)
    token_emb = jnp.take(params["embedding_token"], token_batch, axis=0)
    emb_cat = jnp.concatenate([type_emb, token_emb], axis=1).astype(bf16)  # (N, 2*dim)
    subtree = jnp.take(params["embedding_subtree"], pn_indices.reshape(-1),
                       axis=0).reshape(T, neg, dim).astype(f32)

    eta = jnp.stack([eta_t, eta_l, eta_r], axis=1).astype(f32)             # (N, 3)
    node_idx_row = node_indices.reshape(1, N).astype(jnp.int32)            # (1, N)

    # block_n must be a multiple of 128 (lane-dense index-row block); pad N up
    # to a multiple of block_n. Padded rows carry an out-of-range node index.
    block_n = max(128, (block_n // 128) * 128)
    block_n = min(block_n, -(-N // 128) * 128)
    pad = (-N) % block_n
    if pad:
        emb_cat = jnp.pad(emb_cat, ((0, pad), (0, 0)))
        eta = jnp.pad(eta, ((0, pad), (0, 0)))
        node_idx_row = jnp.pad(node_idx_row, ((0, 0), (0, pad)),
                               constant_values=n_nodes)
    nb = (N + pad) // block_n

    # Algebraic fusion of encoder + tree conv (once, in f32, then bf16 weight):
    #   hidden = cat @ enc_w^T + enc_b ; h3 = hidden @ [w_t^T|w_l^T|w_r^T]
    #   => h3 = cat @ (enc_w^T @ W3) + enc_b @ W3
    w3 = jnp.concatenate([params["w_t"].T, params["w_l"].T, params["w_r"].T],
                         axis=1).astype(f32)                                # (dim, 3*dim)
    w_fused = jnp.dot(params["enc_w"].T.astype(f32), w3,
                      precision=lax.Precision.HIGHEST).astype(bf16)         # (2*dim, 3*dim)
    b_fused = jnp.dot(params["enc_b"].reshape(1, dim).astype(f32), w3,
                      precision=lax.Precision.HIGHEST).astype(f32)          # (1, 3*dim)

    bias_conv = params["bias_conv"].reshape(1, 1).astype(f32)
    alpha = params["alpha"].reshape(1, dim).astype(f32)
    tnidx_col = tree_node_indices.reshape(n_nodes, 1).astype(jnp.int32)
    tnidx_row = tree_node_indices.reshape(1, n_nodes).astype(jnp.int32)
    tidx = tree_indices.reshape(T, 1).astype(jnp.int32)

    kern = functools.partial(infercode_kernel, n_nodes=n_nodes, n_groups=n_groups)

    # VMEM budget from actual need (double-buffered streams + resident
    # operands + accumulator + intermediate headroom), clamped to 64 MiB so
    # the same configuration also fits v7x's smaller physical VMEM.
    stream = 2 * (block_n * 2 * dim * 2          # emb (bf16)
                  + block_n * 128 * 4            # eta (lane-padded f32)
                  + 8 * block_n * 4)             # node-idx row (sublane-padded)
    resident = 2 * (2 * dim * 3 * dim * 2 + 3 * dim * 4 + dim * 4
                    + n_nodes * 128 * 4 + 8 * n_nodes * 4 + T * 128 * 4
                    + T * neg * dim * 4 + T * neg * 4)
    acc_bytes = n_nodes * dim * 4
    work = 6 * block_n * 3 * dim * 4 + 4 * block_n * n_nodes * 2
    vmem_limit = min(64 * 1024 * 1024,
                     max(32 * 1024 * 1024,
                         int(1.25 * (stream + resident + acc_bytes + work))))

    grid_spec = pltpu.PrefetchScalarGridSpec(
        num_scalar_prefetch=0,
        grid=(nb,),
        in_specs=[
            pl.BlockSpec((block_n, 2 * dim), lambda i: (i, 0)),   # emb_cat
            pl.BlockSpec((block_n, 3), lambda i: (i, 0)),         # eta
            pl.BlockSpec((1, block_n), lambda i: (0, i)),         # node_idx row
            pl.BlockSpec((2 * dim, 3 * dim), lambda i: (0, 0)),   # w_fused
            pl.BlockSpec((1, 3 * dim), lambda i: (0, 0)),         # b_fused
            pl.BlockSpec(memory_space=pltpu.MemorySpace.SMEM),    # bias_conv
            pl.BlockSpec((1, dim), lambda i: (0, 0)),             # alpha
            pl.BlockSpec((n_nodes, 1), lambda i: (0, 0)),         # tree_node_idx col
            pl.BlockSpec((1, n_nodes), lambda i: (0, 0)),         # tree_node_idx row
            pl.BlockSpec((T, 1), lambda i: (0, 0)),               # tree_idx
            pl.BlockSpec((T, neg, dim), lambda i: (0, 0, 0)),     # subtree
        ],
        out_specs=pl.BlockSpec((T, neg), lambda i: (0, 0)),
        scratch_shapes=[pltpu.VMEM((n_nodes, dim), jnp.float32)],
    )

    return pl.pallas_call(
        kern,
        grid_spec=grid_spec,
        out_shape=jax.ShapeDtypeStruct((T, neg), jnp.float32),
        compiler_params=pltpu.CompilerParams(
            # The N axis is a reduction into the node_pre accumulator scratch,
            # so it must be "arbitrary" (not sharded across TensorCores).
            dimension_semantics=("arbitrary",),
            vmem_limit_bytes=vmem_limit,
        ),
    )(emb_cat, eta, node_idx_row, w_fused, b_fused, bias_conv, alpha,
      tnidx_col, tnidx_row, tidx, subtree)


def reference_forward(params, type_batch, token_batch, node_indices,
                      eta_t, eta_l, eta_r, tree_node_indices, tree_indices,
                      pn_indices, *, n_nodes, n_groups):
    """Pure-JAX f32 reference mirroring the PyTorch forward."""
    dim = params["embedding_type"].shape[1]
    type_emb = params["embedding_type"][type_batch]
    token_emb = params["embedding_token"][token_batch]
    hidden = (jnp.concatenate([type_emb, token_emb], axis=1) @ params["enc_w"].T
              + params["enc_b"])
    conv = (eta_t[:, None] * (hidden @ params["w_t"].T)
            + eta_l[:, None] * (hidden @ params["w_l"].T)
            + eta_r[:, None] * (hidden @ params["w_r"].T))
    node_pre = jnp.zeros((n_nodes, dim), jnp.float32).at[node_indices].add(conv)
    node_emb = jnp.tanh(node_pre + params["bias_conv"][0])
    scores = node_emb @ params["alpha"]                                   # (n,)
    g_max = jnp.full((n_groups,), -1e30, jnp.float32).at[tree_node_indices].max(scores)
    exp_s = jnp.exp(scores - g_max[tree_node_indices])
    g_sum = jnp.zeros((n_groups,), jnp.float32).at[tree_node_indices].add(exp_s)
    alpha_i = exp_s / g_sum[tree_node_indices]
    code = jnp.zeros((n_groups, dim), jnp.float32).at[tree_node_indices].add(
        node_emb * alpha_i[:, None])
    cv = code[tree_indices]                                               # (T, dim)
    subtree = params["embedding_subtree"][pn_indices]                     # (T, neg, dim)
    return jnp.einsum("tnd,td->tn", subtree, cv)


if __name__ == "__main__":
    # Small, deterministic problem sizes (N > block_n to exercise the grid).
    dim = 128
    type_size = 11
    token_size = 13
    subtree_size = 23
    N = 300             # windowed tree nodes in batch
    n_nodes = 16        # tree nodes in batch
    n_groups = 4        # number of distinct trees
    T = 4               # batch size (trees)
    neg = 8             # positive + negative subtree samples per tree

    key = jax.random.PRNGKey(0)
    keys = jax.random.split(key, 12)

    params = {
        "embedding_type": 0.1 * jax.random.normal(keys[0], (type_size, dim), jnp.float32),
        "embedding_token": 0.1 * jax.random.normal(keys[1], (token_size, dim), jnp.float32),
        "embedding_subtree": 0.1 * jax.random.normal(keys[2], (subtree_size, dim), jnp.float32),
        "enc_w": jax.random.uniform(keys[3], (dim, 2 * dim), jnp.float32, -0.05, 0.05),
        "enc_b": jax.random.uniform(keys[4], (dim,), jnp.float32, -0.05, 0.05),
        "w_t": jax.random.uniform(keys[5], (dim, dim), jnp.float32, 0.0, 0.05),
        "w_l": jax.random.uniform(keys[6], (dim, dim), jnp.float32, 0.0, 0.05),
        "w_r": jax.random.uniform(keys[7], (dim, dim), jnp.float32, 0.0, 0.05),
        "bias_conv": jax.random.uniform(keys[8], (1,), jnp.float32, 0.0, 1.0),
        "alpha": jax.random.uniform(keys[9], (dim,), jnp.float32, 0.0, 0.1),
    }

    type_batch = jax.random.randint(keys[10], (N,), 0, type_size, jnp.int32)
    token_batch = jax.random.randint(keys[11], (N,), 0, token_size, jnp.int32)
    # deterministic scatter targets covering the full output ranges
    node_indices = jnp.arange(N, dtype=jnp.int32) % n_nodes
    tree_node_indices = jnp.arange(n_nodes, dtype=jnp.int32) % n_groups
    tree_indices = jnp.arange(T, dtype=jnp.int32) % n_groups
    pn_indices = (jnp.arange(T * neg, dtype=jnp.int32) % subtree_size).reshape(T, neg)

    ek = jax.random.split(jax.random.PRNGKey(1), 3)
    eta_t = jax.random.uniform(ek[0], (N,), jnp.float32)
    eta_l = jax.random.uniform(ek[1], (N,), jnp.float32)
    eta_r = jax.random.uniform(ek[2], (N,), jnp.float32)

    # block_n=128 here to exercise a multi-step grid (accumulator + tail gating);
    # the production default is block_n=1024.
    logits = infercode_forward(
        params, type_batch, token_batch, node_indices, eta_t, eta_l, eta_r,
        tree_node_indices, tree_indices, pn_indices,
        n_nodes=n_nodes, n_groups=n_groups, block_n=128)
    logits = jax.block_until_ready(logits)

    ref = reference_forward(
        params, type_batch, token_batch, node_indices, eta_t, eta_l, eta_r,
        tree_node_indices, tree_indices, pn_indices,
        n_nodes=n_nodes, n_groups=n_groups)
    ref = jax.block_until_ready(ref)

    assert logits.shape == (T, neg), logits.shape
    # bf16 MXU inputs (fused weight, one-hot scatter path) vs f32 reference
    # -> slightly looser tolerance; f32 accumulation is preserved throughout.
    assert jnp.allclose(logits, ref, rtol=2e-2, atol=3e-2), (
        float(jnp.max(jnp.abs(logits - ref))))
    print("KERNEL_OK")
</pallas_src>

<mosaic_0001>
module attributes {stable_mosaic.version = 11 : i64} {
  func.func @infercode_kernel(%arg0: i32, %arg1: memref<128x256xbf16, #tpu.memory_space<vmem>>, %arg2: memref<128x3xf32, #tpu.memory_space<vmem>>, %arg3: memref<1x128xi32, #tpu.memory_space<vmem>>, %arg4: memref<256x384xbf16, #tpu.memory_space<vmem>>, %arg5: memref<1x384xf32, #tpu.memory_space<vmem>>, %arg6: memref<1x1xf32, #tpu.memory_space<smem>>, %arg7: memref<1x128xf32, #tpu.memory_space<vmem>>, %arg8: memref<16x1xi32, #tpu.memory_space<vmem>>, %arg9: memref<1x16xi32, #tpu.memory_space<vmem>>, %arg10: memref<4x1xi32, #tpu.memory_space<vmem>>, %arg11: memref<4x8x128xf32, #tpu.memory_space<vmem>>, %arg12: memref<4x8xf32, #tpu.memory_space<vmem>>, %arg13: memref<16x128xf32, #tpu.memory_space<vmem>>) attributes {dimension_semantics = [#tpu.dimension_semantics<arbitrary>], iteration_bounds = array<i64: 3>, scalar_prefetch = 0 : i64, scratch_operands = 1 : i64, tpu.core_type = #tpu.core_type<tc>, window_params = [{transform_indices = @transform_0, window_bounds = array<i64: 128, 256>}, {transform_indices = @transform_1, window_bounds = array<i64: 128, 3>}, {transform_indices = @transform_2, window_bounds = array<i64: 1, 128>}, {pipeline_mode = #tpu.pipeline_mode<synchronous>, transform_indices = @transform_3, window_bounds = array<i64: 256, 384>}, {pipeline_mode = #tpu.pipeline_mode<synchronous>, transform_indices = @transform_4, window_bounds = array<i64: 1, 384>}, {transform_indices = @transform_5, window_bounds = array<i64: 1, 1>}, {pipeline_mode = #tpu.pipeline_mode<synchronous>, transform_indices = @transform_6, window_bounds = array<i64: 1, 128>}, {pipeline_mode = #tpu.pipeline_mode<synchronous>, transform_indices = @transform_7, window_bounds = array<i64: 16, 1>}, {pipeline_mode = #tpu.pipeline_mode<synchronous>, transform_indices = @transform_8, window_bounds = array<i64: 1, 16>}, {pipeline_mode = #tpu.pipeline_mode<synchronous>, transform_indices = @transform_9, window_bounds = array<i64: 4, 1>}, {pipeline_mode = #tpu.pipeline_mode<synchronous>, transform_indices = @transform_10, window_bounds = array<i64: 4, 8, 128>}, {pipeline_mode = #tpu.pipeline_mode<synchronous>, transform_indices = @transform_11, window_bounds = array<i64: 4, 8>}]} {
    %c0_i32 = arith.constant 0 : i32
    %0 = arith.cmpi eq, %arg0, %c0_i32 : i32
    %1 = arith.extui %0 : i1 to i32
    %c0_i32_0 = arith.constant 0 : i32
    %2 = arith.cmpi ne, %1, %c0_i32_0 : i32
    scf.if %2 {
      %cst_16 = arith.constant 0.000000e+00 : f32
      %39 = vector.broadcast %cst_16 : f32 to vector<16x128xf32>
      %c0_17 = arith.constant 0 : index
      %c0_18 = arith.constant 0 : index
      %40 = vector.load %arg13[%c0_17, %c0_18] : memref<16x128xf32, #tpu.memory_space<vmem>>, vector<16x128xf32>
      tpu.vector_store %arg13[%c0_17, %c0_18], %39 {strides = array<i32>} : memref<16x128xf32, #tpu.memory_space<vmem>>, vector<16x128xf32>,
    } else {
    }
    %c0 = arith.constant 0 : index
    %c0_1 = arith.constant 0 : index
    %3 = vector.load %arg1[%c0, %c0_1] : memref<128x256xbf16, #tpu.memory_space<vmem>>, vector<128x256xbf16>
    %c0_2 = arith.constant 0 : index
    %c0_3 = arith.constant 0 : index
    %4 = vector.load %arg4[%c0_2, %c0_3] : memref<256x384xbf16, #tpu.memory_space<vmem>>, vector<256x384xbf16>
    %cst = arith.constant dense<0.000000e+00> : vector<128x384xf32>
    %5 = tpu.matmul %3, %4, %cst {dimension_numbers = #tpu.dot_dimension_numbers<[1], [0], [0], [1], [0, 0, 1, 1], [], []>} : vector<128x256xbf16>, vector<256x384xbf16>, vector<128x384xf32> -> vector<128x384xf32>
    %c0_4 = arith.constant 0 : index
    %c0_5 = arith.constant 0 : index
    %6 = vector.load %arg5[%c0_4, %c0_5] : memref<1x384xf32, #tpu.memory_space<vmem>>, vector<1x384xf32>
    %7 = vector.broadcast %6 : vector<1x384xf32> to vector<128x384xf32>
    %8 = arith.addf %5, %7 : vector<128x384xf32>
    %c0_6 = arith.constant 0 : index
    %c0_7 = arith.constant 0 : index
    %9 = vector.load %arg2[%c0_6, %c0_7] : memref<128x3xf32, #tpu.memory_space<vmem>>, vector<128x3xf32>
    %10 = vector.extract_strided_slice %9 {offsets = [0, 0], sizes = [128, 1], strides = [1, 1]} : vector<128x3xf32> to vector<128x1xf32>
    %11 = vector.extract_strided_slice %8 {offsets = [0, 0], sizes = [128, 128], strides = [1, 1]} : vector<128x384xf32> to vector<128x128xf32>
    %12 = vector.broadcast %10 : vector<128x1xf32> to vector<128x128xf32>
    %13 = arith.mulf %12, %11 : vector<128x128xf32>
    %14 = vector.extract_strided_slice %9 {offsets = [0, 1], sizes = [128, 1], strides = [1, 1]} : vector<128x3xf32> to vector<128x1xf32>
    %15 = vector.extract_strided_slice %8 {offsets = [0, 128], sizes = [128, 128], strides = [1, 1]} : vector<128x384xf32> to vector<128x128xf32>
    %16 = vector.broadcast %14 : vector<128x1xf32> to vector<128x128xf32>
    %17 = arith.mulf %16, %15 : vector<128x128xf32>
    %18 = arith.addf %13, %17 : vector<128x128xf32>
    %19 = vector.extract_strided_slice %9 {offsets = [0, 2], sizes = [128, 1], strides = [1, 1]} : vector<128x3xf32> to vector<128x1xf32>
    %20 = vector.extract_strided_slice %8 {offsets = [0, 256], sizes = [128, 128], strides = [1, 1]} : vector<128x384xf32> to vector<128x128xf32>
    %21 = vector.broadcast %19 : vector<128x1xf32> to vector<128x128xf32>
    %22 = arith.mulf %21, %20 : vector<128x128xf32>
    %23 = arith.addf %18, %22 : vector<128x128xf32>
    %24 = tpu.iota {dimensions = array<i32: 0>} : vector<16x128xi32>
    %c0_8 = arith.constant 0 : index
    %c0_9 = arith.constant 0 : index
    %25 = vector.load %arg3[%c0_8, %c0_9] : memref<1x128xi32, #tpu.memory_space<vmem>>, vector<1x128xi32>
    %26 = vector.broadcast %25 : vector<1x128xi32> to vector<16x128xi32>
    %27 = arith.cmpi eq, %24, %26 : vector<16x128xi32>
    %28 = arith.extui %27 : vector<16x128xi1> to vector<16x128xi32>
    %29 = arith.sitofp %28 : vector<16x128xi32> to vector<16x128xf32>
    %30 = arith.truncf %29 : vector<16x128xf32> to vector<16x128xbf16>
    %c0_10 = arith.constant 0 : index
    %c0_11 = arith.constant 0 : index
    %31 = vector.load %arg13[%c0_10, %c0_11] : memref<16x128xf32, #tpu.memory_space<vmem>>, vector<16x128xf32>
    %32 = arith.truncf %23 : vector<128x128xf32> to vector<128x128xbf16>
    %cst_12 = arith.constant dense<0.000000e+00> : vector<16x128xf32>
    %33 = tpu.matmul %30, %32, %cst_12 {dimension_numbers = #tpu.dot_dimension_numbers<[1], [0], [0], [1], [0, 0, 1, 1], [], []>} : vector<16x128xbf16>, vector<128x128xbf16>, vector<16x128xf32> -> vector<16x128xf32>
    %34 = arith.addf %31, %33 : vector<16x128xf32>
    %c0_13 = arith.constant 0 : index
    %c0_14 = arith.constant 0 : index
    %35 = vector.load %arg13[%c0_13, %c0_14] : memref<16x128xf32, #tpu.memory_space<vmem>>, vector<16x128xf32>
    tpu.vector_store %arg13[%c0_13, %c0_14], %34 {strides = array<i32>} : memref<16x128xf32, #tpu.memory_space<vmem>>, vector<16x128xf32>,
    %c2_i32 = arith.constant 2 : i32
    %36 = arith.cmpi eq, %arg0, %c2_i32 : i32
    %37 = arith.extui %36 : i1 to i32
    %c0_i32_15 = arith.constant 0 : i32
    %38 = arith.cmpi ne, %37, %c0_i32_15 : i32
    scf.if %38 {
      %c0_16 = arith.constant 0 : index
      %c0_17 = arith.constant 0 : index
      %39 = vector.load %arg13[%c0_16, %c0_17] : memref<16x128xf32, #tpu.memory_space<vmem>>, vector<16x128xf32>
      %c0_18 = arith.constant 0 : index
      %c0_19 = arith.constant 0 : index
      %40 = memref.load %arg6[%c0_18, %c0_19] : memref<1x1xf32, #tpu.memory_space<smem>>
      %41 = vector.broadcast %40 : f32 to vector<16x128xf32>
      %42 = arith.addf %39, %41 : vector<16x128xf32>
      %43 = math.tanh %42 : vector<16x128xf32>
      %c0_20 = arith.constant 0 : index
      %c0_21 = arith.constant 0 : index
      %44 = vector.load %arg7[%c0_20, %c0_21] : memref<1x128xf32, #tpu.memory_space<vmem>>, vector<1x128xf32>
      %45 = vector.broadcast %44 : vector<1x128xf32> to vector<16x128xf32>
      %46 = arith.mulf %43, %45 : vector<16x128xf32>
      %cst_22 = arith.constant dense<0.000000e+00> : vector<16xf32>
      %47 = vector.multi_reduction <add>, %46, %cst_22 [1] : vector<16x128xf32> to vector<16xf32>
      %48 = vector.shape_cast %47 : vector<16xf32> to vector<16x1xf32>
      %49 = tpu.iota {dimensions = array<i32: 1>} : vector<16x4xi32>
      %c0_23 = arith.constant 0 : index
      %c0_24 = arith.constant 0 : index
      %50 = vector.load %arg8[%c0_23, %c0_24] : memref<16x1xi32, #tpu.memory_space<vmem>>, vector<16x1xi32>
      %51 = vector.broadcast %50 : vector<16x1xi32> to vector<16x4xi32>
      %52 = arith.cmpi eq, %49, %51 : vector<16x4xi32>
      %53 = tpu.iota {dimensions = array<i32: 0>} : vector<4x16xi32>
      %c0_25 = arith.constant 0 : index
      %c0_26 = arith.constant 0 : index
      %54 = vector.load %arg9[%c0_25, %c0_26] : memref<1x16xi32, #tpu.memory_space<vmem>>, vector<1x16xi32>
      %55 = vector.broadcast %54 : vector<1x16xi32> to vector<4x16xi32>
      %56 = arith.cmpi eq, %53, %55 : vector<4x16xi32>
      %57 = arith.extui %56 : vector<4x16xi1> to vector<4x16xi32>
      %58 = arith.sitofp %57 : vector<4x16xi32> to vector<4x16xf32>
      %cst_27 = arith.constant -1.000000e+30 : f32
      %59 = vector.shape_cast %48 : vector<16x1xf32> to vector<16x1xf32>
      %60 = vector.broadcast %59 : vector<16x1xf32> to vector<16x4xf32>
      %61 = vector.broadcast %cst_27 : f32 to vector<16x4xf32>
      %62 = arith.select %52, %60, %61 : vector<16x4xi1>, vector<16x4xf32>
      %cst_28 = arith.constant dense<0xFF800000> : vector<4xf32>
      %63 = vector.multi_reduction <maximumf>, %62, %cst_28 [0] : vector<16x4xf32> to vector<4xf32>
      %64 = vector.shape_cast %63 : vector<4xf32> to vector<1x4xf32>
      %65 = arith.extui %52 : vector<16x4xi1> to vector<16x4xi32>
      %66 = arith.sitofp %65 : vector<16x4xi32> to vector<16x4xf32>
      %67 = vector.broadcast %64 : vector<1x4xf32> to vector<16x4xf32>
      %68 = arith.mulf %66, %67 : vector<16x4xf32>
      %cst_29 = arith.constant dense<0.000000e+00> : vector<16xf32>
      %69 = vector.multi_reduction <add>, %68, %cst_29 [1] : vector<16x4xf32> to vector<16xf32>
      %70 = vector.shape_cast %69 : vector<16xf32> to vector<16x1xf32>
      %71 = arith.subf %48, %70 : vector<16x1xf32>
      %72 = math.exp %71 : vector<16x1xf32>
      %cst_30 = arith.constant dense<0.000000e+00> : vector<4x1xf32>
      %73 = tpu.matmul %58, %72, %cst_30 {dimension_numbers = #tpu.dot_dimension_numbers<[1], [0], [0], [1], [0, 0, 1, 1], [], []>} : vector<4x16xf32>, vector<16x1xf32>, vector<4x1xf32> -> vector<4x1xf32>
      %74 = vector.broadcast %72 : vector<16x1xf32> to vector<16x128xf32>
      %75 = arith.mulf %43, %74 : vector<16x128xf32>
      %cst_31 = arith.constant dense<0.000000e+00> : vector<4x128xf32>
      %76 = tpu.matmul %58, %75, %cst_31 {dimension_numbers = #tpu.dot_dimension_numbers<[1], [0], [0], [1], [0, 0, 1, 1], [], []>} : vector<4x16xf32>, vector<16x128xf32>, vector<4x128xf32> -> vector<4x128xf32>
      %cst_32 = arith.constant 0.000000e+00 : f32
      %77 = vector.broadcast %cst_32 : f32 to vector<4x1xf32>
      %78 = arith.cmpf ogt, %73, %77 : vector<4x1xf32>
      %cst_33 = arith.constant 1.000000e+00 : f32
      %79 = vector.broadcast %cst_33 : f32 to vector<4x1xf32>
      %80 = arith.select %78, %73, %79 : vector<4x1xi1>, vector<4x1xf32>
      %81 = vector.broadcast %80 : vector<4x1xf32> to vector<4x128xf32>
      %82 = arith.divf %76, %81 : vector<4x128xf32>
      %83 = tpu.iota {dimensions = array<i32: 1>} : vector<4x4xi32>
      %c0_34 = arith.constant 0 : index
      %c0_35 = arith.constant 0 : index
      %84 = vector.load %arg10[%c0_34, %c0_35] : memref<4x1xi32, #tpu.memory_space<vmem>>, vector<4x1xi32>
      %85 = vector.broadcast %84 : vector<4x1xi32> to vector<4x4xi32>
      %86 = arith.cmpi eq, %83, %85 : vector<4x4xi32>
      %87 = arith.extui %86 : vector<4x4xi1> to vector<4x4xi32>
      %88 = arith.sitofp %87 : vector<4x4xi32> to vector<4x4xf32>
      %cst_36 = arith.constant dense<0.000000e+00> : vector<4x128xf32>
      %89 = tpu.matmul %88, %82, %cst_36 {dimension_numbers = #tpu.dot_dimension_numbers<[1], [0], [0], [1], [0, 0, 1, 1], [], []>} : vector<4x4xf32>, vector<4x128xf32>, vector<4x128xf32> -> vector<4x128xf32>
      %c0_37 = arith.constant 0 : index
      %c0_38 = arith.constant 0 : index
      %c0_39 = arith.constant 0 : index
      %90 = vector.load %arg11[%c0_37, %c0_38, %c0_39] : memref<4x8x128xf32, #tpu.memory_space<vmem>>, vector<4x8x128xf32>
      %91 = vector.shape_cast %89 : vector<4x128xf32> to vector<4x1x128xf32>
      %92 = vector.broadcast %91 : vector<4x1x128xf32> to vector<4x8x128xf32>
      %93 = arith.mulf %90, %92 : vector<4x8x128xf32>
      %cst_40 = arith.constant dense<0.000000e+00> : vector<4x8xf32>
      %94 = vector.multi_reduction <add>, %93, %cst_40 [2] : vector<4x8x128xf32> to vector<4x8xf32>
      %c0_41 = arith.constant 0 : index
      %c0_42 = arith.constant 0 : index
      %95 = vector.load %arg12[%c0_41, %c0_42] : memref<4x8xf32, #tpu.memory_space<vmem>>, vector<4x8xf32>
      tpu.vector_store %arg12[%c0_41, %c0_42], %94 {strides = array<i32>} : memref<4x8xf32, #tpu.memory_space<vmem>>, vector<4x8xf32>,
    } else {
    }
    return
  }
  func.func @transform_0(%arg0: i32) -> (i32, i32) {
    %c0_i32 = arith.constant 0 : i32
    %c0_i32_0 = arith.constant 0 : i32
    return %arg0, %c0_i32 : i32, i32
  }
  func.func @transform_1(%arg0: i32) -> (i32, i32) {
    %c0_i32 = arith.constant 0 : i32
    %c0_i32_0 = arith.constant 0 : i32
    return %arg0, %c0_i32 : i32, i32
  }
  func.func @transform_2(%arg0: i32) -> (i32, i32) {
    %c0_i32 = arith.constant 0 : i32
    %c0_i32_0 = arith.constant 0 : i32
    return %c0_i32, %arg0 : i32, i32
  }
  func.func @transform_3(%arg0: i32) -> (i32, i32) {
    %c0_i32 = arith.constant 0 : i32
    %c0_i32_0 = arith.constant 0 : i32
    %c0_i32_1 = arith.constant 0 : i32
    return %c0_i32, %c0_i32_0 : i32, i32
  }
  func.func @transform_4(%arg0: i32) -> (i32, i32) {
    %c0_i32 = arith.constant 0 : i32
    %c0_i32_0 = arith.constant 0 : i32
    %c0_i32_1 = arith.constant 0 : i32
    return %c0_i32, %c0_i32_0 : i32, i32
  }
  func.func @transform_5(%arg0: i32) -> (i32, i32) {
    %c0_i32 = arith.constant 0 : i32
    %c0_i32_0 = arith.constant 0 : i32
    %c0_i32_1 = arith.constant 0 : i32
    return %c0_i32, %c0_i32_0 : i32, i32
  }
  func.func @transform_6(%arg0: i32) -> (i32, i32) {
    %c0_i32 = arith.constant 0 : i32
    %c0_i32_0 = arith.constant 0 : i32
    %c0_i32_1 = arith.constant 0 : i32
    return %c0_i32, %c0_i32_0 : i32, i32
  }
  func.func @transform_7(%arg0: i32) -> (i32, i32) {
    %c0_i32 = arith.constant 0 : i32
    %c0_i32_0 = arith.constant 0 : i32
    %c0_i32_1 = arith.constant 0 : i32
    return %c0_i32, %c0_i32_0 : i32, i32
  }
  func.func @transform_8(%arg0: i32) -> (i32, i32) {
    %c0_i32 = arith.constant 0 : i32
    %c0_i32_0 = arith.constant 0 : i32
    %c0_i32_1 = arith.constant 0 : i32
    return %c0_i32, %c0_i32_0 : i32, i32
  }
  func.func @transform_9(%arg0: i32) -> (i32, i32) {
    %c0_i32 = arith.constant 0 : i32
    %c0_i32_0 = arith.constant 0 : i32
    %c0_i32_1 = arith.constant 0 : i32
    return %c0_i32, %c0_i32_0 : i32, i32
  }
  func.func @transform_10(%arg0: i32) -> (i32, i32, i32) {
    %c0_i32 = arith.constant 0 : i32
    %c0_i32_0 = arith.constant 0 : i32
    %c0_i32_1 = arith.constant 0 : i32
    %c0_i32_2 = arith.constant 0 : i32
    return %c0_i32, %c0_i32_0, %c0_i32_1 : i32, i32, i32
  }
  func.func @transform_11(%arg0: i32) -> (i32, i32) {
    %c0_i32 = arith.constant 0 : i32
    %c0_i32_0 = arith.constant 0 : i32
    %c0_i32_1 = arith.constant 0 : i32
    return %c0_i32, %c0_i32_0 : i32, i32
  }
}

</mosaic_0001>

<bundles_post_ra>
// kernel: tpu_custom_call.1
= control target key start
LH: loop header
LB: loop body
LE: loop exit
PB: predicated region body
PF: predicated region fallthrough
CT: control target
= control target key end

     0   :  { %s3006_s0 = inlined_call_operand.vmem [shape: bf16[384,256], index: 0, kind: input, shape index: {}]   ;;  %s3007_s1 = inlined_call_operand.vmem [shape: f32[384,3], index: 1, kind: input, shape index: {}]   ;;  %s3008_s2 = inlined_call_operand.vmem [shape: s32[1,384], index: 2, kind: input, shape index: {}]   ;;  %s3009_s3 = inlined_call_operand.hbm [shape: bf16[256,384], index: 3, kind: input, shape index: {}]   ;;  %s3010_s4 = inlined_call_operand.vmem [shape: f32[1,384], index: 4, kind: input, shape index: {}]   ;;  %s3011_s5 = inlined_call_operand.<no memory space> [shape: f32[1,1], index: 5, kind: input, shape index: {}]   ;;  %s3012_s6 = inlined_call_operand.vmem [shape: f32[1,128], index: 6, kind: input, shape index: {}]   ;;  %s3013_s7 = inlined_call_operand.vmem [shape: s32[16,1], index: 7, kind: input, shape index: {}]   ;;  %s3014_s8 = inlined_call_operand.vmem [shape: s32[1,16], index: 8, kind: input, shape index: {}]   ;;  %s3015_s9 = inlined_call_operand.vmem [shape: s32[4,1], index: 9, kind: input, shape index: {}]   ;;  %s3016_s10 = inlined_call_operand.vmem [shape: f32[4,8,128], index: 10, kind: input, shape index: {}]   ;;  %s3017_s11 = inlined_call_operand.hbm [shape: f32[4,8], index: 11, kind: output, shape index: {}]  }
   0x1   :  { %16 = sst [smem:[#allocation3]] %s3011_s5 }
   0x2   :  { %17 = vsyncpa [#allocation5], 0 }
   0x3   :  { %18 = vsyncpa [#allocation6], 0  ;;  %s2462_s19 = smov 0  }
   0x4 LB: > { %s2468_s20 = sadd.s32 4294967295, %s2382_s19   ;;  %p1938_p0 = scmp.ge.s32.totalorder %s2382_s19, 1  ;;  %s2382_s19 = sphi %s2462_s19, %s24_s19  }
   0x5   : > { %p296_p1 = scmp.lt.s32.totalorder %s2382_s19, 4  ;;  %s2384_s5 = smov [#allocation4]  }
   0x6   : > { %s308_s21 = sshll.u32 %s2384_s5, 4  ;;  %p2166_p4 = scmp.eq.s32.totalorder %s2468_s20, 0  ;;  %s309_s21 = int_to_ptr.vmem [resolvable:$true] %s308_s21 }
   0x7   : > { %p2473_p3 = pnand %p1938_p0, %p296_p1  ;;  %s2329_s23 = scalar_lea.vmem %s309_s21, 6144 }
   0x8   : > { %p2330_p8 = scmp.ne.s32.totalorder %s309_s21, %s2329_s23  ;;  %p2337_p11 = scmp.lt.s32.totalorder %s309_s21, %s309_s21 }
   0x9   : > { %p2162_p5 = pneg %p2473_p3  ;;  %p2338_p12 = scmp.lt.s32.totalorder %s2329_s23, %s2329_s23 }
   0xb   : > { %p2163_p6 = pnand %p2166_p4, %p2162_p5  ;;  %p2339_p13 = por %p2338_p12, %p2337_p11 }
   0xd   : > { %p2320_p7 = pneg %p2163_p6 }
   0xf   : > { %p2332_p9 = pnand %p2330_p8, %p2320_p7 }
  0x11   : > { %p2333_p10 = pneg %p2332_p9 }
  0x13   : > { %p2340_p2 = pnand %p2339_p13, %p2333_p10 }
  0x15   : > { %2343 = shalt.err (!%p2340_p2)
}
  0x16   : > { %s2385_s24 = smov 192   ;;  %s2386_s25 = smov 12  }
  0x17   : > { %2165 = dma.hbm_to_vmem [thread:$0]  (!%p2163_p6), %s3009_s3, 6144, %s309_s21, [#allocation5], %s2385_s24, %s2385_s24, %s2386_s25  }
  0x18   : > { %370 = sbr.rel (%p2473_p3) target bundleno = 1647 (0x66f), region = 64 }
  0x1d   : > { %2373 = dma.done.wait (%p2166_p4), [#allocation5], 6144  }
  0x1e   : > { %2375 = vsyncadd (%p2166_p4), [#allocation5], 4294961152  ;;  %s1943_s28 = sshll.u32 %s2468_s20, 4  ;;  %p427_p0 = scmp.lt.s32.totalorder %s2468_s20, 2 }
  0x1f   : > { %p415_p1 = scmp.lt.s32.totalorder %s1943_s28, 47  ;;  %p3031_p2 = scmp.ne.s32.totalorder %s2468_s20, 0 }
  0x20   : > { %s2494_s29 = scalar_select %p427_p0, %s2468_s20, 2 }
  0x21   : > { %s3098_s28 = smov (!%p415_p1, %s1943_s28), 47  ;;  %434 = sbr.rel (%p3031_p2) target bundleno = 40 (0x28), region = 72 }
  0x22   : > { %s429_s13 = scalar_lea.vmem %s3008_s2, %s2494_s29  ;;  %s2033_s14 = sshll.u32 %s3098_s28, 3 }
  0x23   : > { %s2503_s17 = scalar_lea.vmem %s3006_s0, %s2033_s14  ;;  %s2508_s21 = scalar_lea.vmem %s3007_s1, %s2033_s14 }
  0x26   : > { %v2387_v0 = vmov 0.0  }
  0x27   : > { %435 = vst [vmem:[#allocation2] sm:$0xff] %v2387_v0  ;;  %436 = vst [vmem:[#allocation2 + $0x8] sm:$0xff] %v2387_v0 }
  0x28 PF: > { %v2513_v1 = vld [vmem:[%s2508_s21 + $0x70] sm:$0xff]  ;;  %v2388_v2 = vmov 1   ;;  %v2218_v3 = vld [vmem:[#allocation4 + $0xac] ss:$12 sps:$4 sm:$0xff]   ;;  %v2389_v4 = vmov 0   ;;  %v2390_v16 = vmov 2  }
  0x29   : > { %2194 = vset.pattern.permute.xlu1 %v2388_v2  ;;  %2193 = vset.pattern.permute.xlu0 %v2389_v4  ;;  %v2220_v5 = vld [vmem:[#allocation4 + $0x170] ss:$12 sps:$4 sm:$0xff]   ;;  %v2221_v6 = vld [vmem:[#allocation4 + $0xa8] ss:$12 sps:$4 sm:$0xff]   ;;  %v2225_v10 = vld [vmem:[#allocation4 + $0x158] ss:$12 sps:$4 sm:$0xff]  }
  0x2a   : > { %1249 = vperm.xlu1 %2194, %v2513_v1   ;;  %1168 = vperm.xlu0 %2193, %v2513_v1   ;;  %v2222_v7 = vld [vmem:[#allocation4 + $0xb0] ss:$12 sps:$4 sm:$0xff]   ;;  %v1095_v8 = vld [vmem:[%s2508_s21 + $0x78] sm:$0xff]  ;;  %v2223_v9 = vld [vmem:[#allocation4 + $0x94] ss:$12 sps:$4 sm:$0xff]   ;;  %vm2392_vm0 = vmmov 0  }
  0x2b   : > { %870 = vmatprep.subr.bf16.mxu0 %v2218_v3  ;;  %2034 = vmatprep.subr.bf16.mxu1 %v2220_v5  ;;  %v2226_v11 = vld [vmem:[#allocation4 + $0x90] ss:$12 sps:$4 sm:$0xff]   ;;  %v2227_v12 = vld [vmem:[#allocation4 + $0x98] ss:$12 sps:$4 sm:$0xff]   ;;  %v2230_v14 = vld [vmem:[#allocation4 + $0x140] ss:$12 sps:$4 sm:$0xff]  }
  0x2c   : > { %871 = vmatpush1.bf16.msra.mxu0 %v2221_v6  ;;  %2035 = vmatpush3.bf16.msra.mxu1 %v2222_v7  ;;  %v2228_v13 = vld [vmem:[#allocation4 + $0x7c] ss:$12 sps:$4 sm:$0xff]   ;;  %v2231_v15 = vld [vmem:[#allocation4 + $0x78] ss:$12 sps:$4 sm:$0xff]   ;;  %v2232_v17 = vld [vmem:[#allocation4 + $0x80] ss:$12 sps:$4 sm:$0xff]  }
  0x2d   : > { %872 = vmatprep.subr.bf16.mxu0 %v2223_v9  ;;  %2036 = vmatprep.subr.bf16.mxu1 %v2225_v10  ;;  %v2233_v18 = vld [vmem:[#allocation4 + $0x64] ss:$12 sps:$4 sm:$0xff]   ;;  %v2235_v19 = vld [vmem:[#allocation4 + $0x128] ss:$12 sps:$4 sm:$0xff]   ;;  %v2236_v21 = vld [vmem:[#allocation4 + $0x60] ss:$12 sps:$4 sm:$0xff]  }
  0x2e   : > { %1253 = vperm.xlu1 %2194, %v1095_v8   ;;  %1173 = vperm.xlu0 %2193, %v1095_v8   ;;  %v2522_v20 = vld [vmem:[%s2508_s21 + $0x60] sm:$0xff]  ;;  %v2238_v23 = vld [vmem:[#allocation4 + $0x4c] ss:$12 sps:$4 sm:$0xff]   ;;  %v2248_v32 = vld [vmem:[#allocation4 + $0x1c] ss:$12 sps:$4 sm:$0xff]   ;;  %p2018_p3 = scmp.ne.s32.totalorder %s2468_s20, 2 }
  0x2f   : > { %v2237_v22 = vld [vmem:[#allocation4 + $0x68] ss:$12 sps:$4 sm:$0xff]   ;;  %v2240_v24 = vld [vmem:[#allocation4 + $0x110] ss:$12 sps:$4 sm:$0xff]   ;;  %v2245_v28 = vld [vmem:[#allocation4 + $0xf8] ss:$12 sps:$4 sm:$0xff]  }
  0x30   : > { %873 = vmatpush1.bf16.msra.mxu0 %v2226_v11  ;;  %2037 = vmatpush3.bf16.msra.mxu1 %v2227_v12  ;;  %v2241_v25 = vld [vmem:[#allocation4 + $0x48] ss:$12 sps:$4 sm:$0xff]   ;;  %v2242_v26 = vld [vmem:[#allocation4 + $0x50] ss:$12 sps:$4 sm:$0xff]   ;;  %v2247_v30 = vld [vmem:[#allocation4 + $0x38] ss:$12 sps:$4 sm:$0xff]  }
  0x31   : > { %874 = vmatprep.subr.bf16.mxu0 %v2228_v13  ;;  %2038 = vmatprep.subr.bf16.mxu1 %v2230_v14  ;;  %v2243_v27 = vld [vmem:[#allocation4 + $0x34] ss:$12 sps:$4 sm:$0xff]   ;;  %v2246_v29 = vld [vmem:[#allocation4 + $0x30] ss:$12 sps:$4 sm:$0xff]   ;;  %v2251_v34 = vld [vmem:[#allocation4 + $0x18] ss:$12 sps:$4 sm:$0xff]  }
  0x32   : > { %2195 = vset.pattern.permute.xlu1 %v2390_v16  ;;  %v1093_v31 = vld [vmem:[%s2508_s21 + $0x68] sm:$0xff]  ;;  %v2250_v33 = vld [vmem:[#allocation4 + $0xe0] ss:$12 sps:$4 sm:$0xff]   ;;  %v2253_v36 = vld [vmem:[#allocation4 + $0x4] ss:$12 sps:$4 sm:$0xff]   ;;  %s1460_s26 = sld [smem:[#allocation3]] (!%p2018_p3) }
  0x33   : > { %1349 = vperm.xlu1 %2195, %v1095_v8   ;;  %1163 = vperm.xlu0 %2193, %v1093_v31   ;;  %v2252_v35 = vld [vmem:[#allocation4 + $0x20] ss:$12 sps:$4 sm:$0xff]   ;;  %v2255_v37 = vld [vmem:[#allocation4 + $0xc8] ss:$12 sps:$4 sm:$0xff]   ;;  %v2532_v41 = vld [vmem:[%s2503_s17] ss:$8 sps:$4 sm:$0xff]  }
  0x34   : > { %875 = vmatpush1.bf16.msra.mxu0 %v2231_v15  ;;  %2039 = vmatpush3.bf16.msra.mxu1 %v2232_v17  ;;  %v2256_v38 = vld [vmem:[#allocation4] ss:$12 sps:$4 sm:$0xff]   ;;  %v2257_v39 = vld [vmem:[#allocation4 + $0x8] ss:$12 sps:$4 sm:$0xff]   ;;  %v2266_v48 = vld [vmem:[#allocation4 + $0x150] ss:$12 sps:$4 sm:$0xff]  }
  0x35   : > { %876 = vmatprep.subr.bf16.mxu0 %v2233_v18  ;;  %2040 = vmatprep.subr.bf16.mxu1 %v2235_v19  ;;  %v2260_v40 = vld [vmem:[%s2503_s17 + $0x4] ss:$8 sps:$4 sm:$0xff]   ;;  %v2535_v42 = vld [vmem:[%s2508_s21 + $0x50] sm:$0xff]  ;;  %v2261_v43 = vld [vmem:[#allocation4 + $0x16c] ss:$12 sps:$4 sm:$0xff]  }
  0x36   : > { %1015 = vmatprep.mubr.bf16.mxu1 %v2260_v40  ;;  %v2263_v44 = vld [vmem:[#allocation4 + $0x168] ss:$12 sps:$4 sm:$0xff]   ;;  %902 = vmatprep.mubr.bf16.mxu0 %v2260_v40  ;;  %v2538_v46 = vld [vmem:[%s2503_s17 + $0x14] ss:$8 sps:$4 sm:$0xff]   ;;  %v1089_v55 = vld [vmem:[%s2508_s21 + $0x48] sm:$0xff] }
  0x37   : > { %2196 = vset.pattern.permute.xlu1 %v2389_v4  ;;  %v2264_v45 = vld [vmem:[#allocation4 + $0x154] ss:$12 sps:$4 sm:$0xff]   ;;  %v1091_v47 = vld [vmem:[%s2508_s21 + $0x58] sm:$0xff]  ;;  %v2272_v51 = vld [vmem:[#allocation4 + $0x138] ss:$12 sps:$4 sm:$0xff]  }
  0x38   : > { %1158 = vperm.xlu1 %2196, %v2522_v20   ;;  %877 = vmatpush1.bf16.msra.mxu0 %v2236_v21  ;;  %v2269_v49 = vld [vmem:[#allocation4 + $0x13c] ss:$12 sps:$4 sm:$0xff]   ;;  %v2273_v53 = vld [vmem:[#allocation4 + $0x124] ss:$12 sps:$4 sm:$0xff]   ;;  %v2275_v54 = vld [vmem:[#allocation4 + $0x120] ss:$12 sps:$4 sm:$0xff]  }
  0x39   : > { %2041 = vmatpush3.bf16.msra.mxu1 %v2237_v22  ;;  %878 = vmatprep.subr.bf16.mxu0 %v2238_v23  ;;  %v2548_v50 = vld [vmem:[%s2503_s17 + $0x10] ss:$8 sps:$4 sm:$0xff]   ;;  %v2551_v52 = vld [vmem:[%s2503_s17 + $0x24] ss:$8 sps:$4 sm:$0xff]   ;;  %v2278_v56 = vld [vmem:[#allocation4 + $0x10c] ss:$12 sps:$4 sm:$0xff]  }
  0x3a   : > { %2042 = vmatprep.subr.bf16.mxu1 %v2240_v24  ;;  %1153 = vperm.xlu0 %2193, %v1091_v47   ;;  %v2558_v57 = vld [vmem:[%s2503_s17 + $0x20] ss:$8 sps:$4 sm:$0xff]   ;;  %v2281_v58 = vld [vmem:[#allocation4 + $0x108] ss:$12 sps:$4 sm:$0xff]   ;;  %v2285_v62 = vld [vmem:[%s2503_s17 + $0x34] ss:$8 sps:$4 sm:$0xff]  }
  0x3b   : > { %v2561_v59 = vld [vmem:[%s2508_s21 + $0x38] sm:$0xff]  ;;  %v2282_v60 = vld [vmem:[#allocation4 + $0xf4] ss:$12 sps:$4 sm:$0xff]   ;;  %v2568_v63 = vld [vmem:[%s2508_s21 + $0x28] sm:$0xff] }
  0x3c   : > { %2197 = vset.pattern.permute.xlu1 %v2388_v2  ;;  %879 = vmatpush1.bf16.msra.mxu0 %v2241_v25  ;;  %v1088_v61 = vld [vmem:[%s2508_s21 + $0x40] sm:$0xff]  ;;  %v2287_v3 = vld [vmem:[#allocation4 + $0xdc] ss:$12 sps:$4 sm:$0xff]   ;;  %v2290_v7 = vld [vmem:[#allocation4 + $0xd8] ss:$12 sps:$4 sm:$0xff]  }
  0x3d   : > { %2043 = vmatpush3.bf16.msra.mxu1 %v2242_v26  ;;  %1241 = vperm.xlu1 %2197, %v2522_v20   ;;  %v2284_v0 = vld [vmem:[#allocation4 + $0xf0] ss:$12 sps:$4 sm:$0xff]   ;;  %v2289_v5 = vld [vmem:[%s2503_s17 + $0x30] ss:$8 sps:$4 sm:$0xff]   ;;  %v2297_v13 = vld [vmem:[%s2503_s17 + $0x54] ss:$8 sps:$4 sm:$0xff]  }
  0x3e   : > { %880 = vmatprep.subr.bf16.mxu0 %v2243_v27  ;;  %2044 = vmatprep.subr.bf16.mxu1 %v2245_v28  ;;  %v2574_v6 = vld [vmem:[%s2508_s21 + $0x18] sm:$0xff]  ;;  %v2294_v8 = vld [vmem:[%s2503_s17 + $0x44] ss:$8 sps:$4 sm:$0xff]   ;;  %v2291_v9 = vld [vmem:[#allocation4 + $0xc4] ss:$12 sps:$4 sm:$0xff]  }
  0x3f   : > { %1143 = vperm.xlu0 %2193, %v1089_v55   ;;  %v2580_v10 = vld [vmem:[%s2508_s21 + $0x8] sm:$0xff]  ;;  %v2293_v11 = vld [vmem:[#allocation4 + $0xc0] ss:$12 sps:$4 sm:$0xff]   ;;  %v1080_v22 = vld [vmem:[%s2508_s21] sm:$0xff] }
  0x40   : > { %881 = vmatpush1.bf16.msra.mxu0 %v2246_v29  ;;  %v2296_v12 = vld [vmem:[%s2503_s17 + $0x40] ss:$8 sps:$4 sm:$0xff]   ;;  %v1086_v14 = vld [vmem:[%s2508_s21 + $0x30] sm:$0xff]  ;;  %v2300_v17 = vld [vmem:[%s2503_s17 + $0x64] ss:$8 sps:$4 sm:$0xff]  }
  0x41   : > { %2045 = vmatpush3.bf16.msra.mxu1 %v2247_v30  ;;  %1245 = vperm.xlu1 %2197, %v1093_v31   ;;  %v2299_v15 = vld [vmem:[%s2503_s17 + $0x50] ss:$8 sps:$4 sm:$0xff]   ;;  %v2303_v18 = vld [vmem:[%s2503_s17 + $0x74] ss:$8 sps:$4 sm:$0xff]  }
  0x42   : > { %882 = vmatprep.subr.bf16.mxu0 %v2248_v32  ;;  %2046 = vmatprep.subr.bf16.mxu1 %v2250_v33  ;;  %v2305_v19 = vld [vmem:[%s2503_s17 + $0x70] ss:$8 sps:$4 sm:$0xff]  }
  0x43   : > { %1133 = vperm.xlu0 %2193, %v2561_v59   ;;  %v1082_v21 = vld [vmem:[%s2508_s21 + $0x10] sm:$0xff] }
  0x44   : > { %883 = vmatpush1.bf16.msra.mxu0 %v2251_v34 }
  0x45   : > { %2047 = vmatpush3.bf16.msra.mxu1 %v2252_v35  ;;  %2198 = vset.pattern.permute.xlu1 %v2390_v16 }
  0x46   : > { %1341 = vperm.xlu1 %2198, %v1093_v31   ;;  %884 = vmatprep.subr.bf16.mxu0 %v2253_v36 }
  0x47   : > { %2048 = vmatprep.subr.bf16.mxu1 %v2255_v37  ;;  %1123 = vperm.xlu0 %2193, %v2568_v63  }
  0x48   : > { %885 = vmatpush1.bf16.msra.mxu0 %v2256_v38 }
  0x49   : > { %2049 = vmatpush3.bf16.msra.mxu1 %v2257_v39  ;;  %886 = vmatprep.subr.bf16.mxu0 %v2261_v43  ;;  %v3019_v43 = vmov 0.0  }
  0x4a   : > { %2199 = vset.pattern.permute.xlu1 %v2389_v4  ;;  %2115 = vmatprep.subr.bf16.mxu1 %v3019_v43 }
  0x4b   : > { %1148 = vperm.xlu1 %2199, %v2535_v42   ;;  %1113 = vperm.xlu0 %2193, %v2574_v6  }
  0x4c   : > { %1016 = vmatmul.mubr.bf16.vlgmr.msra.gmra.mxu1 %v2532_v41  ;;  %887 = vmatpush2.bf16.msra.mxu0 %v2263_v44 }
  0x4d   : > { %888 = vmatprep.subr.bf16.mxu0 %v2264_v45  ;;  %1023 = vmatprep.mubr.bf16.mxu1 %v2538_v46 }
  0x4f   : > { %2200 = vset.pattern.permute.xlu1 %v2388_v2  ;;  %1103 = vperm.xlu0 %2193, %v2580_v10  }
  0x50   : > { %1233 = vperm.xlu1 %2200, %v2535_v42   ;;  %889 = vmatpush2.bf16.msra.mxu0 %v2266_v48 }
  0x51   : > { %890 = vmatprep.subr.bf16.mxu0 %v2269_v49 }
  0x53   : > { %2215 = vset.pattern.permute.xlu0 %v2390_v16 }
  0x54   : > { %1024 = vmatmul.mubr.bf16.gmra.mxu1 %v2548_v50  ;;  %1237 = vperm.xlu1 %2200, %v1091_v47  }
  0x55   : > { %891 = vmatpush2.bf16.msra.mxu0 %v2272_v51  ;;  %1031 = vmatprep.mubr.bf16.mxu1 %v2551_v52 }
  0x56   : > { %892 = vmatprep.subr.bf16.mxu0 %v2273_v53  ;;  %1345 = vperm.xlu0 %2215, %v2513_v1   ;;  %v2302_v1 = vld [vmem:[%s2503_s17 + $0x60] ss:$8 sps:$4 sm:$0xff]  }
  0x58   : > { %2201 = vset.pattern.permute.xlu1 %v2390_v16 }
  0x59   : > { %893 = vmatpush2.bf16.msra.mxu0 %v2275_v54  ;;  %1333 = vperm.xlu1 %2201, %v1091_v47  }
  0x5a   : > { %894 = vmatprep.subr.bf16.mxu0 %v2278_v56  ;;  %1337 = vperm.xlu0 %2215, %v2522_v20   ;;  %v1084_v20 = vld [vmem:[%s2508_s21 + $0x20] sm:$0xff] }
  0x5c   : > { %1032 = vmatmul.mubr.bf16.gmra.mxu1 %v2558_v57 }
  0x5d   : > { %895 = vmatpush2.bf16.msra.mxu0 %v2281_v58  ;;  %2202 = vset.pattern.permute.xlu1 %v2389_v4 }
  0x5e   : > { %1138 = vperm.xlu1 %2202, %v1088_v61   ;;  %896 = vmatprep.subr.bf16.mxu0 %v2282_v60 }
  0x5f   : > { %1039 = vmatprep.mubr.bf16.mxu1 %v2285_v62  ;;  %1329 = vperm.xlu0 %2215, %v2535_v42  }
  0x61   : > { %897 = vmatpush2.bf16.msra.mxu0 %v2284_v0 }
  0x62   : > { %2203 = vset.pattern.permute.xlu1 %v2388_v2  ;;  %898 = vmatprep.subr.bf16.mxu0 %v2287_v3 }
  0x63   : > { %1225 = vperm.xlu1 %2203, %v1088_v61   ;;  %1321 = vperm.xlu0 %2215, %v1088_v61  }
  0x64   : > { %1040 = vmatmul.mubr.bf16.gmra.mxu1 %v2289_v5 }
  0x65   : > { %899 = vmatpush2.bf16.msra.mxu0 %v2290_v7  ;;  %1047 = vmatprep.mubr.bf16.mxu1 %v2294_v8 }
  0x66   : > { %900 = vmatprep.subr.bf16.mxu0 %v2291_v9 }
  0x67   : > { %1229 = vperm.xlu1 %2203, %v1089_v55   ;;  %1313 = vperm.xlu0 %2215, %v1086_v14  }
  0x69   : > { %901 = vmatpush2.bf16.msra.mxu0 %v2293_v11 }
  0x6b   : > { %2204 = vset.pattern.permute.xlu1 %v2390_v16  ;;  %1305 = vperm.xlu0 %2215, %v1084_v20  }
  0x6c   : > { %903 = vmatmul.mubr.bf16.vlgmr.msra.gmra.mxu0 %v2532_v41  ;;  %1048 = vmatmul.mubr.bf16.gmra.mxu1 %v2296_v12 }
  0x6d   : > { %1325 = vperm.xlu1 %2204, %v1089_v55   ;;  %912 = vmatprep.mubr.bf16.mxu0 %v2538_v46 }
  0x6e   : > { %1055 = vmatprep.mubr.bf16.mxu1 %v2297_v13 }
  0x6f   : > { %1297 = vperm.xlu0 %2215, %v1082_v21  }
  0x71   : > { %2205 = vset.pattern.permute.xlu1 %v2389_v4 }
  0x72   : > { %1128 = vperm.xlu1 %2205, %v1086_v14  }
  0x73   : > { %1289 = vperm.xlu0 %2215, %v1080_v22  }
  0x74   : > { %913 = vmatmul.mubr.bf16.gmra.mxu0 %v2548_v50  ;;  %1056 = vmatmul.mubr.bf16.gmra.mxu1 %v2299_v15 }
  0x75   : > { %922 = vmatprep.mubr.bf16.mxu0 %v2551_v52  ;;  %1063 = vmatprep.mubr.bf16.mxu1 %v2300_v17 }
  0x76   : > { %2206 = vset.pattern.permute.xlu1 %v2388_v2 }
  0x77   : > { %1217 = vperm.xlu1 %2206, %v1086_v14  }
  0x7b   : > { %1221 = vperm.xlu1 %2206, %v2561_v59  }
  0x7c   : > { %923 = vmatmul.mubr.bf16.gmra.mxu0 %v2558_v57  ;;  %1064 = vmatmul.mubr.bf16.gmra.mxu1 %v2302_v1 }
  0x7d   : > { %932 = vmatprep.mubr.bf16.mxu0 %v2285_v62  ;;  %1071 = vmatprep.mubr.bf16.mxu1 %v2303_v18 }
  0x7f   : > { %2207 = vset.pattern.permute.xlu1 %v2390_v16 }
  0x80   : > { %1317 = vperm.xlu1 %2207, %v2561_v59  }
  0x84   : > { %2208 = vset.pattern.permute.xlu1 %v2389_v4  ;;  %933 = vmatmul.mubr.bf16.gmra.mxu0 %v2289_v5 }
  0x85   : > { %1072 = vmatmul.mubr.bf16.gmra.mxu1 %v2305_v19  ;;  %1118 = vperm.xlu1 %2208, %v1084_v20  }
  0x86   : > { %942 = vmatprep.mubr.bf16.mxu0 %v2294_v8  ;;  %2131 = vmatprep.mubr.msk.bf16.mxu1 %vm2392_vm0, %v3019_v43 }
  0x89   : > { %2209 = vset.pattern.permute.xlu1 %v2388_v2 }
  0x8a   : > { %1209 = vperm.xlu1 %2209, %v1084_v20  }
  0x8c   : > { %943 = vmatmul.mubr.bf16.gmra.mxu0 %v2296_v12  ;;  %v3018_v12 = vlaneseq }
  0x8d   : > { %952 = vmatprep.mubr.bf16.mxu0 %v2297_v13 }
  0x8e   : > { %1213 = vperm.xlu1 %2209, %v2568_v63  }
  0x92   : > { %2210 = vset.pattern.permute.xlu1 %v2390_v16 }
  0x93   : > { %1309 = vperm.xlu1 %2210, %v2568_v63  }
  0x94   : > { %953 = vmatmul.mubr.bf16.gmra.mxu0 %v2299_v15 }
  0x95   : > { %962 = vmatprep.mubr.bf16.mxu0 %v2300_v17 }
  0x97   : > { %2211 = vset.pattern.permute.xlu1 %v2389_v4 }
  0x98   : > { %1108 = vperm.xlu1 %2211, %v1082_v21  }
  0x9c   : > { %2212 = vset.pattern.permute.xlu1 %v2388_v2  ;;  %963 = vmatmul.mubr.bf16.gmra.mxu0 %v2302_v1  ;;  %v2713_v1 = vshrl.u32 %v3018_v12, 7 }
  0x9d   : > { %1201 = vperm.xlu1 %2212, %v1082_v21   ;;  %972 = vmatprep.mubr.bf16.mxu0 %v2303_v18 }
  0x9e   : > { %3049 = vst [vmem:[#allocation27_spill] sm:$0xff] %v2713_v1 }
  0xa1   : > { %1205 = vperm.xlu1 %2212, %v2574_v6  }
  0xa4   : > { %973 = vmatmul.mubr.bf16.gmra.mxu0 %v2305_v19 }
  0xa5   : > { %2213 = vset.pattern.permute.xlu1 %v2390_v16  ;;  %v2618_v23 = vpop.permute.xlu1 %1249  ;;  %v2644_v31 = vpop.permute.xlu0 %1168 }
  0xa6   : > { %1301 = vperm.xlu1 %2213, %v2574_v6  }
  0xa9   : > { %v2621_v24 = vpop.permute.xlu1 %1253  ;;  %v2648_v33 = vpop.permute.xlu0 %1173 }
  0xaa   : > { %2214 = vset.pattern.permute.xlu1 %v2389_v4 }
  0xab   : > { %1098 = vperm.xlu1 %2214, %v1080_v22  }
  0xae   : > { %v2624_v25 = vpop.permute.xlu1 %1349  ;;  %v2652_v34 = vpop.permute.xlu0 %1163 }
  0xaf   : > { %2216 = vset.pattern.permute.xlu1 %v2388_v2 }
  0xb0   : > { %1193 = vperm.xlu1 %2216, %v1080_v22   ;;  %v2724_v22 = vsub.s32 0, %v2713_v1 }
  0xb2   : > { %3051 = vst [vmem:[#allocation29_spill] sm:$0xff] %v2724_v22 }
  0xb3   : > { %v2627_v26 = vpop.permute.xlu1 %1158 }
  0xb4   : > { %1197 = vperm.xlu1 %2216, %v2580_v10  }
  0xb5   : > { %v2656_v36 = vpop.permute.xlu0 %1153 }
  0xb8   : > { %2217 = vset.pattern.permute.xlu1 %v2390_v16  ;;  %v2631_v27 = vpop.permute.xlu1 %1241 }
  0xb9   : > { %1293 = vperm.xlu1 %2217, %v2580_v10  }
  0xba   : > { %v2660_v38 = vpop.permute.xlu0 %1143 }
  0xbb   : > { %3035 = vst [vmem:[#allocation13_spill] sm:$0xff] %v2660_v38 }
  0xbc   : > { %v2634_v28 = vpop.permute.xlu1 %1245 }
  0xbe   : > { %v2666_v41 = vpop.permute.xlu0 %1133 }
  0xbf   : > { %3038 = vst [vmem:[#allocation16_spill] sm:$0xff] %v2666_v41 }
  0xc1   : > { %v2636_v29 = vpop.permute.xlu1 %1341 }
  0xc2   : > { %v2671_v44 = vpop.permute.xlu0 %1123 }
  0xc3   : > { %3040 = vst [vmem:[#allocation18_spill] sm:$0xff] %v2671_v44 }
  0xc6   : > { %v2638_v4 = vpop.permute.xlu1 %1148  ;;  %v2675_v46 = vpop.permute.xlu0 %1113 }
  0xca   : > { %v2679_v48 = vpop.permute.xlu0 %1103 }
  0xcb   : > { %v2640_v30 = vpop.permute.xlu1 %1233 }
  0xcf   : > { %v2642_v2 = vpop.permute.xlu1 %1237 }
  0xd1   : > { %v2685_v51 = vpop.permute.xlu0 %1345 }
  0xd4   : > { %v2646_v32 = vpop.permute.xlu1 %1333 }
  0xd5   : > { %3032 = vst [vmem:[#allocation10_spill] sm:$0xff] %v2646_v32  ;;  %v2689_v53 = vpop.permute.xlu0 %1337 }
  0xd9   : > { %v2650_v16 = vpop.permute.xlu1 %1138 }
  0xda   : > { %3033 = vst [vmem:[#allocation11_spill] sm:$0xff] %v2650_v16  ;;  %v2693_v59 = vpop.permute.xlu0 %1329 }
  0xdb   : > { %3045 = vst [vmem:[#allocation23_spill] sm:$0xff] %v2693_v59 }
  0xde   : > { %v2654_v35 = vpop.permute.xlu1 %1225  ;;  %v2698_v5 = vpop.permute.xlu0 %1321 }
  0xdf   : > { %3034 = vst [vmem:[#allocation12_spill] sm:$0xff] %v2654_v35  ;;  %3046 = vst [vmem:[#allocation24_spill] sm:$0xff] %v2698_v5 }
  0xe2   : > { %v2658_v37 = vpop.permute.xlu1 %1229  ;;  %v2706_v13 = vpop.permute.xlu0 %1313 }
  0xe3   : > { %3047 = vst [vmem:[#allocation25_spill] sm:$0xff] %v2706_v13 }
  0xe6   : > { %v2719_v20 = vpop.permute.xlu0 %1305 }
  0xe8   : > { %v2662_v39 = vpop.permute.xlu1 %1325 }
  0xe9   : > { %3036 = vst [vmem:[#allocation14_spill] sm:$0xff] %v2662_v39 }
  0xed   : > { %v2664_v40 = vpop.permute.xlu1 %1128 }
  0xee   : > { %3037 = vst [vmem:[#allocation15_spill] sm:$0xff] %v2664_v40 }
  0xf2   : > { %v2668_v42 = vpop.permute.xlu1 %1217 }
  0xf3   : > { %3039 = vst [vmem:[#allocation17_spill] sm:$0xff] %v2668_v42 }
  0xf6   : > { %v2673_v45 = vpop.permute.xlu1 %1221 }
  0xf7   : > { %3041 = vst [vmem:[#allocation19_spill] sm:$0xff] %v2673_v45 }
  0xfb   : > { %v2677_v47 = vpop.permute.xlu1 %1317 }
  0xfc   : > { %3042 = vst [vmem:[#allocation20_spill] sm:$0xff] %v2677_v47 }
 0x100   : > { %v2681_v49 = vpop.permute.xlu1 %1118 }
 0x105   : > { %v2683_v50 = vpop.permute.xlu1 %1209 }
 0x109   : > { %v2687_v52 = vpop.permute.xlu1 %1213 }
 0x10a   : > { %3043 = vst [vmem:[#allocation21_spill] sm:$0xff] %v2687_v52 }
 0x10c   : > { %v2050_v54 = vpop.f32.mrf.mxu1 }
 0x10e   : > { %v2051_v55 = vpop.f32.mrf.mxu1  ;;  %v2691_v56 = vpop.permute.xlu1 %1309 }
 0x10f   : > { %3044 = vst [vmem:[#allocation22_spill] sm:$0xff] %v2691_v56  ;;  %v2052_v57 = vadd.f32 %v2051_v55, %v2050_v54  ;;  %v517_v54 = vld [vmem:[%s3010_s4] sm:$0x7] }
 0x110   : > { %v2053_v58 = vpop.f32.mrf.mxu1 }
 0x112   : > { %v2054_v60 = vpop.f32.mrf.mxu1 }
 0x113   : > { %v2055_v61 = vadd.f32 %v2054_v60, %v2053_v58  ;;  %v2696_v62 = vpop.permute.xlu1 %1108  ;;  %v529_v60 = vsub.s32 2, %v2713_v1 }
 0x114   : > { %v2056_v63 = vpop.f32.mrf.mxu1 }
 0x116   : > { %v2057_v0 = vpop.f32.mrf.mxu1 }
 0x117   : > { %v2058_v3 = vadd.f32 %v2057_v0, %v2056_v63  ;;  %v525_v63 = vsub.s32 1, %v2713_v1 }
 0x118   : > { %v2059_v6 = vpop.f32.mrf.mxu1  ;;  %v2700_v7 = vpop.permute.xlu1 %1201 }
 0x119   : > { %v2742_v43 = vrot.slane %v517_v54, %v525_v63 }
 0x11a   : > { %v2060_v8 = vpop.f32.mrf.mxu1 }
 0x11b   : > { %v2702_v9 = vadd.f32 %v2060_v8, %v2059_v6  ;;  %v1298_v6 = vpop.permute.xlu0 %1297  ;;  %v2736_v8 = vrot.slane %v517_v54, %v2724_v22 }
 0x11c   : > { %v2062_v10 = vpop.f32.mrf.mxu1  ;;  %v2704_v11 = vpop.permute.xlu1 %1205 }
 0x11e   : > { %v2063_v14 = vpop.f32.mrf.mxu1 }
 0x11f   : > { %v2708_v15 = vadd.f32 %v2063_v14, %v2062_v10  ;;  %v2740_v14 = vrot.slane %v517_v54, %v529_v60  ;;  %v1290_v52 = vpop.permute.xlu0 %1289 }
 0x120   : > { %v2710_v17 = vpop.f32.mrf.mxu1 }
 0x121   : > { %3048 = vst [vmem:[#allocation26_spill] sm:$0xff] %v2710_v17  ;;  %v2715_v18 = vpop.permute.xlu1 %1301  ;;  %v1018_v22 = vadd.f32 %v2052_v57, %v2740_v14 }
 0x122   : > { %v2717_v19 = vpop.f32.mrf.mxu1 }
 0x123   : > { %3050 = vst [vmem:[#allocation28_spill] sm:$0xff] %v2717_v19  ;;  %v1352_v17 = vmul.f32 %v1290_v52, %v1018_v22 }
 0x124   : > { %v2721_v21 = vpop.f32.mrf.mxu1 }
 0x126   : > { %v2729_v55 = vpop.f32.mrf.mxu1  ;;  %v1099_v58 = vpop.permute.xlu1 %1098 }
 0x128   : > { %v2733_v0 = vpop.f32.mrf.mxu1 }
 0x12a   : > { %v2738_v10 = vpop.f32.mrf.mxu1 }
 0x12b   : > { %v1194_v12 = vpop.permute.xlu1 %1193 }
 0x12c   : > { %v904_v56 = vpop.f32.mrf.mxu0  ;;  %v2744_v13 = vpop.f32.mrf.mxu1 }
 0x12d   : > { %v905_v44 = vadd.f32 %v904_v56, %v2736_v8 }
 0x12e   : > { %v906_v47 = vpop.f32.mrf.mxu0  ;;  %v2747_v1 = vpop.f32.mrf.mxu1 }
 0x12f   : > { %v907_v40 = vadd.f32 %v906_v47, %v2742_v43  ;;  %v1198_v5 = vpop.permute.xlu1 %1197  ;;  %v1176_v42 = vmul.f32 %v1099_v58, %v905_v44  ;;  %v1021_v47 = vadd.f32 %v2055_v61, %v2740_v14 }
 0x130   : > { %v908_v41 = vpop.f32.mrf.mxu0  ;;  %v2751_v60 = vpop.f32.mrf.mxu1 }
 0x131   : > { %v1256_v54 = vmul.f32 %v1194_v12, %v907_v40  ;;  %v909_v63 = vadd.f32 %v908_v41, %v2736_v8  ;;  %v1026_v41 = vadd.f32 %v2058_v3, %v2740_v14 }
 0x132   : > { %v910_v39 = vpop.f32.mrf.mxu0  ;;  %v2755_v16 = vpop.f32.mrf.mxu1 }
 0x133   : > { %v1272_v19 = vadd.f32 %v1256_v54, %v1176_v42  ;;  %v911_v56 = vadd.f32 %v910_v39, %v2742_v43  ;;  %v1177_v45 = vmul.f32 %v2679_v48, %v909_v63 }
 0x134   : > { %v1294_v57 = vpop.permute.xlu1 %1293  ;;  %v914_v59 = vpop.f32.mrf.mxu0 }
 0x135   : > { %v2759_v38 = vadd.f32 %v1352_v17, %v1272_v19  ;;  %v1257_v35 = vmul.f32 %v1198_v5, %v911_v56  ;;  %v1353_v44 = vmul.f32 %v1294_v57, %v1021_v47  ;;  %v915_v40 = vadd.f32 %v914_v59, %v2736_v8  ;;  %v2080_v12 = vpop.f32.mrf.mxu1 }
 0x136   : > { %v916_v42 = vpop.f32.mrf.mxu0  ;;  %v1354_v5 = vmul.f32 %v1298_v6, %v1026_v41  ;;  %v1029_v59 = vadd.f32 %v2702_v9, %v2740_v14  ;;  %v1034_v9 = vadd.f32 %v2708_v15, %v2740_v14  ;;  %v2076_v15 = vadd.f32 %v2747_v1, %v2744_v13 }
 0x137   : > { %3052 = vst [vmem:[#allocation30_spill] sm:$0xff] %v2759_v38  ;;  %v1273_v52 = vadd.f32 %v1257_v35, %v1177_v45  ;;  %v917_v39 = vadd.f32 %v916_v42, %v2742_v43  ;;  %v1178_v48 = vmul.f32 %v2696_v62, %v915_v40  ;;  %v2081_v3 = vpop.f32.mrf.mxu1 }
 0x138   : > { %v918_v22 = vpop.f32.mrf.mxu0  ;;  %v1355_v57 = vmul.f32 %v2715_v18, %v1029_v59  ;;  %v2821_v32 = vadd.f32 %v2076_v15, %v2740_v14 }
 0x139   : > { %v2764_v58 = vadd.f32 %v1353_v44, %v1273_v52  ;;  %v1258_v61 = vmul.f32 %v2700_v7, %v917_v39  ;;  %v919_v17 = vadd.f32 %v918_v22, %v2736_v8  ;;  %v2083_v44 = vpop.f32.mrf.mxu1  ;;  %v1356_v22 = vmul.f32 %v2719_v20, %v1034_v9 }
 0x13a   : > { %v920_v19 = vpop.f32.mrf.mxu0 }
 0x13b   : > { %3053 = vst [vmem:[#allocation31_spill] sm:$0xff] %v2764_v58  ;;  %v1274_v45 = vadd.f32 %v1258_v61, %v1178_v48  ;;  %v921_v54 = vadd.f32 %v920_v19, %v2742_v43  ;;  %v1179_v62 = vmul.f32 %v2675_v46, %v919_v17  ;;  %v2084_v18 = vpop.f32.mrf.mxu1  ;;  %v2082_v58 = vadd.f32 %v2081_v3, %v2080_v12 }
 0x13c   : > { %v924_v63 = vpop.f32.mrf.mxu0 }
 0x13d   : > { %v2774_v56 = vadd.f32 %v1354_v5, %v1274_v45  ;;  %v1259_v7 = vmul.f32 %v2704_v11, %v921_v54  ;;  %v925_v6 = vadd.f32 %v924_v63, %v2736_v8  ;;  %v2086_v19 = vpop.f32.mrf.mxu1 }
 0x13e   : > { %v926_v47 = vpop.f32.mrf.mxu0 }
 0x13f   : > { %3054 = vst [vmem:[#allocation32_spill] sm:$0xff] %v2774_v56  ;;  %v1275_v40 = vadd.f32 %v1259_v7, %v1179_v62  ;;  %v927_v41 = vadd.f32 %v926_v47, %v2742_v43  ;;  %v1180_v46 = vmul.f32 %v2681_v49, %v925_v6 }
 0x140   : > { %v2783_v42 = vpop.f32.mrf.mxu0 }
 0x141   : > { %3055 = vst [vmem:[#allocation33_spill] sm:$0xff] %v2783_v42  ;;  %v2785_v52 = vadd.f32 %v1355_v57, %v1275_v40  ;;  %v1260_v11 = vmul.f32 %v2683_v50, %v927_v41  ;;  %v2087_v50 = vpop.f32.mrf.mxu1  ;;  %v2818_v42 = vadd.f32 %v2738_v10, %v2733_v0 }
 0x142   : > { %v2789_v39 = vpop.f32.mrf.mxu0 }
 0x143   : > { %3056 = vst [vmem:[#allocation34_spill] sm:$0xff] %v2785_v52  ;;  %3057 = vst [vmem:[#allocation35_spill] sm:$0xff] %v2789_v39  ;;  %v1276_v48 = vadd.f32 %v1260_v11, %v1180_v46  ;;  %v2089_v54 = vpop.f32.mrf.mxu1  ;;  %v2814_v52 = vadd.f32 %v2729_v55, %v2721_v21  ;;  %v2079_v21 = vadd.f32 %v2755_v16, %v2751_v60 }
 0x144   : > { %v2794_v61 = vpop.f32.mrf.mxu0  ;;  %v1058_v55 = vadd.f32 %v2082_v58, %v2740_v14 }
 0x145   : > { %3058 = vst [vmem:[#allocation36_spill] sm:$0xff] %v2794_v61  ;;  %v2796_v17 = vadd.f32 %v1356_v22, %v1276_v48  ;;  %v2090_v7 = vpop.f32.mrf.mxu1  ;;  %v2088_v61 = vadd.f32 %v2087_v50, %v2086_v19 }
 0x146   : > { %v2798_v5 = vpop.f32.mrf.mxu0  ;;  %v2091_v0 = vadd.f32 %v2090_v7, %v2089_v54 }
 0x147   : > { %3059 = vst [vmem:[#allocation37_spill] sm:$0xff] %v2796_v17  ;;  %3060 = vst [vmem:[#allocation38_spill] sm:$0xff] %v2798_v5  ;;  %v2092_v57 = vpop.f32.mrf.mxu1  ;;  %v2085_v17 = vadd.f32 %v2084_v18, %v2083_v44 }
 0x148   : > { %v2800_v59 = vpop.f32.mrf.mxu0 }
 0x149   : > { %3061 = vst [vmem:[#allocation39_spill] sm:$0xff] %v2800_v59  ;;  %v2093_v41 = vpop.f32.mrf.mxu1 }
 0x14a   : > { %v2802_v49 = vpop.f32.mrf.mxu0  ;;  %v2094_v39 = vadd.f32 %v2093_v41, %v2092_v57 }
 0x14b   : > { %v2095_v22 = vpop.f32.mrf.mxu1 }
 0x14c   : > { %v2804_v45 = vpop.f32.mrf.mxu0  ;;  %v1074_v15 = vadd.f32 %v2094_v39, %v2740_v14 }
 0x14d   : > { %v2096_v38 = vpop.f32.mrf.mxu1 }
 0x14e   : > { %v2806_v20 = vpop.f32.mrf.mxu0  ;;  %v2097_v59 = vadd.f32 %v2096_v38, %v2095_v22  ;;  %v1061_v38 = vadd.f32 %v2085_v17, %v2740_v14 }
 0x150   : > { %v2808_v63 = vpop.f32.mrf.mxu0  ;;  %v1077_v16 = vadd.f32 %v2097_v59, %v2740_v14 }
 0x152   : > { %v950_v62 = vpop.f32.mrf.mxu0 }
 0x153   : > { %v951_v41 = vadd.f32 %v950_v62, %v2742_v43 }
 0x154   : > { %v954_v6 = vpop.f32.mrf.mxu0 }
 0x156   : > { %v956_v47 = vpop.f32.mrf.mxu0 }
 0x157   : > { %v957_v54 = vadd.f32 %v956_v47, %v2742_v43 }
 0x158   : > { %v958_v9 = vpop.f32.mrf.mxu0 }
 0x15a   : > { %v960_v40 = vpop.f32.mrf.mxu0 }
 0x15b   : > { %v961_v60 = vadd.f32 %v960_v40, %v2742_v43 }
 0x15c   : > { %v964_v46 = vpop.f32.mrf.mxu0 }
 0x15d   : > { %v1267_v47 = vmul.f32 %v2642_v2, %v961_v60  ;;  %v3070_v60 = vld [vmem:[#allocation19_spill] sm:$0xff] }
 0x15e   : > { %v966_v11 = vpop.f32.mrf.mxu0 }
 0x15f   : > { %v967_v10 = vadd.f32 %v966_v11, %v2742_v43 }
 0x160   : > { %v968_v48 = vpop.f32.mrf.mxu0 }
 0x161   : > { %v969_v44 = vadd.f32 %v968_v48, %v2736_v8  ;;  %v1268_v39 = vmul.f32 %v2631_v27, %v967_v10  ;;  %v3064_v10 = vld [vmem:[#allocation39_spill] sm:$0xff] }
 0x162   : > { %v970_v35 = vpop.f32.mrf.mxu0 }
 0x163   : > { %v971_v13 = vadd.f32 %v970_v35, %v2742_v43  ;;  %v1189_v59 = vmul.f32 %v2652_v34, %v969_v44 }
 0x164   : > { %v974_v56 = vpop.f32.mrf.mxu0 }
 0x165   : > { %v975_v1 = vadd.f32 %v974_v56, %v2736_v8  ;;  %v1066_v56 = vadd.f32 %v2088_v61, %v2740_v14  ;;  %v1269_v19 = vmul.f32 %v2634_v28, %v971_v13  ;;  %v959_v61 = vadd.f32 %v958_v9, %v2736_v8 }
 0x166   : > { %v976_v5 = vpop.f32.mrf.mxu0  ;;  %v1366_v28 = vmul.f32 %v2685_v51, %v1074_v15  ;;  %v3068_v15 = vld [vmem:[#allocation35_spill] sm:$0xff] }
 0x167   : > { %v977_v12 = vadd.f32 %v976_v5, %v2742_v43  ;;  %v965_v5 = vadd.f32 %v964_v46, %v2736_v8  ;;  %v1190_v17 = vmul.f32 %v2644_v31, %v975_v1  ;;  %v1367_v31 = vmul.f32 %v2624_v25, %v1077_v16  ;;  %v3062_v1 = vld [vmem:[#allocation10_spill] sm:$0xff] }
 0x168   : > { %v978_v3 = vpop.f32.mrf.mxu0  ;;  %v955_v46 = vadd.f32 %v954_v6, %v2736_v8  ;;  %v1285_v27 = vadd.f32 %v1269_v19, %v1189_v59  ;;  %v1266_v25 = vmul.f32 %v2640_v30, %v957_v54  ;;  %v1187_v51 = vmul.f32 %v2656_v36, %v959_v61  ;;  %v3072_v19 = vld [vmem:[#allocation11_spill] sm:$0xff]  ;;  %v3073_v61 = vld [vmem:[#allocation26_spill] sm:$0xff] }
 0x169   : > { %v1270_v18 = vmul.f32 %v2618_v23, %v977_v12  ;;  %v979_v35 = vadd.f32 %v978_v3, %v2736_v8  ;;  %v1069_v23 = vadd.f32 %v2091_v0, %v2740_v14  ;;  %v1188_v9 = vmul.f32 %v2627_v26, %v965_v5  ;;  %v3063_v0 = vld [vmem:[#allocation38_spill] sm:$0xff]  ;;  %v3065_v3 = vld [vmem:[#allocation12_spill] sm:$0xff] }
 0x16a   : > { %v980_v58 = vpop.f32.mrf.mxu0  ;;  %v1364_v2 = vmul.f32 %v2689_v53, %v1066_v56  ;;  %v941_v26 = vadd.f32 %v2802_v49, %v2742_v43  ;;  %v1186_v48 = vmul.f32 %v2638_v4, %v955_v46  ;;  %v1053_v36 = vadd.f32 %v2079_v21, %v2740_v14  ;;  %v3067_v4 = vld [vmem:[#allocation23_spill] sm:$0xff] }
 0x16b   : > { %v981_v50 = vadd.f32 %v980_v58, %v2742_v43  ;;  %v1286_v7 = vadd.f32 %v1270_v18, %v1190_v17  ;;  %v1191_v57 = vmul.f32 %v2648_v33, %v979_v35  ;;  %v1365_v34 = vmul.f32 %v2636_v29, %v1069_v23 }
 0x16c   : > { %v947_v33 = vadd.f32 %v2806_v20, %v2742_v43  ;;  %v1284_v62 = vadd.f32 %v1268_v39, %v1188_v9  ;;  %v945_v29 = vadd.f32 %v2804_v45, %v2736_v8  ;;  %v1265_v20 = vmul.f32 %v2658_v37, %v951_v41  ;;  %v3066_v45 = vld [vmem:[#allocation13_spill] sm:$0xff]  ;;  %v3074_v39 = vld [vmem:[#allocation28_spill] sm:$0xff] }
 0x16d   : > { %v1271_v40 = vmul.f32 %v2621_v24, %v981_v50  ;;  %v949_v24 = vadd.f32 %v2808_v63, %v2736_v8  ;;  %v1382_v6 = vadd.f32 %v1366_v28, %v1286_v7  ;;  %v1283_v63 = vadd.f32 %v1267_v47, %v1187_v51  ;;  %v3075_v7 = vld [vmem:[#allocation14_spill] sm:$0xff]  ;;  %v3077_v28 = vld [vmem:[#allocation17_spill] sm:$0xff]  ;;  %v3078_v41 = vld [vmem:[#allocation16_spill] sm:$0xff] }
 0x16e   : > { %v1381_v13 = vadd.f32 %v1365_v34, %v1285_v27  ;;  %v1363_v12 = vmul.f32 %v3062_v1, %v1061_v38  ;;  %v937_v53 = vadd.f32 %v3063_v0, %v2742_v43  ;;  %v939_v49 = vadd.f32 %v3064_v10, %v2736_v8  ;;  %v3069_v38 = vld [vmem:[#allocation36_spill] sm:$0xff] }
 0x16f   : > { %v1287_v11 = vadd.f32 %v1271_v40, %v1191_v57  ;;  %v1264_v44 = vmul.f32 %v3065_v3, %v947_v33  ;;  %v1185_v18 = vmul.f32 %v3066_v45, %v949_v24  ;;  %v1282_v37 = vadd.f32 %v1266_v25, %v1186_v48  ;;  %v3076_v57 = vld [vmem:[#allocation33_spill] sm:$0xff]  ;;  %v3081_v24 = vld [vmem:[#allocation15_spill] sm:$0xff]  ;;  %v3088_v45 = vld [vmem:[#allocation34_spill] sm:$0xff] }
 0x170   : > { %v1380_v35 = vadd.f32 %v1364_v2, %v1284_v62  ;;  %v1362_v56 = vmul.f32 %v3067_v4, %v1058_v55  ;;  %v931_v21 = vadd.f32 %v3068_v15, %v2742_v43  ;;  %v935_v16 = vadd.f32 %v3069_v38, %v2736_v8  ;;  %v3080_v33 = vld [vmem:[#allocation21_spill] sm:$0xff]  ;;  %v3092_v4 = vld [vmem:[#allocation30_spill] sm:$0xff] }
 0x171   : > { %v1383_v22 = vadd.f32 %v1367_v31, %v1287_v11  ;;  %v1263_v58 = vmul.f32 %v3070_v60, %v941_v26  ;;  %v3071_v5 = vmov 0.0   ;;  %v1184_v17 = vmul.f32 %v3072_v19, %v945_v29  ;;  %v3079_v11 = vld [vmem:[#allocation24_spill] sm:$0xff]  ;;  %v3083_v26 = vld [vmem:[#allocation18_spill] sm:$0xff] }
 0x172   : > { %v1281_v50 = vadd.f32 %v1265_v20, %v1185_v18  ;;  %v1379_v23 = vadd.f32 %v1363_v12, %v1283_v63  ;;  %v1407_v54 = vpack.c.bf16 %v1381_v13, %v1380_v35  ;;  %v2067_v59 = vadd.f32 %v3074_v39, %v3073_v61  ;;  %v3089_v18 = vld [vmem:[#allocation32_spill] sm:$0xff]  ;;  %v3091_v35 = vld [vmem:[#allocation31_spill] sm:$0xff] }
 0x173   : > { %v1408_v30 = vpack.c.bf16 %v1383_v22, %v1382_v6  ;;  %v1045_v55 = vadd.f32 %v2818_v42, %v2740_v14  ;;  %v1361_v43 = vmul.f32 %v3075_v7, %v1053_v36  ;;  %v929_v40 = vadd.f32 %v3076_v57, %v2736_v8  ;;  %v3082_v22 = vld [vmem:[#allocation20_spill] sm:$0xff]  ;;  %v3085_v36 = vld [vmem:[#allocation22_spill] sm:$0xff] }
 0x174   : > { %v1262_v31 = vmul.f32 %v3077_v28, %v937_v53  ;;  %v1183_v46 = vmul.f32 %v3078_v41, %v939_v49  ;;  %v1280_v47 = vadd.f32 %v1264_v44, %v1184_v17  ;;  %v1378_v9 = vadd.f32 %v1362_v56, %v1282_v37  ;;  %v3086_v53 = vld [vmem:[#allocation37_spill] sm:$0xff]  ;;  %v3087_v49 = vld [vmem:[#allocation27_spill] sm:$0xff] }
 0x175   : > { %2116 = vmatpush3.bf16.msra.mxu1 %v1408_v30  ;;  %v1042_v27 = vadd.f32 %v2814_v52, %v2740_v14  ;;  %v1360_v34 = vmul.f32 %v3079_v11, %v2821_v32  ;;  %v1261_v42 = vmul.f32 %v3080_v33, %v931_v21  ;;  %v1182_v25 = vmul.f32 %v3081_v24, %v935_v16  ;;  %v3084_v32 = vld [vmem:[#allocation25_spill] sm:$0xff]  ;;  %v2013_v44 = vld [vmem:[%s429_s13] ss:$0 sm:$0xff] }
 0x176   : > { %2117 = vmatprep.subr.bf16.mxu1 %v3071_v5  ;;  %v1279_v8 = vadd.f32 %v1263_v58, %v1183_v46  ;;  %v1377_v51 = vadd.f32 %v1361_v43, %v1281_v50  ;;  %v1406_v62 = vpack.c.bf16 %v1379_v23, %v1378_v9  ;;  %v1037_v6 = vadd.f32 %v2067_v59, %v2740_v14  ;;  %v1399_v21 = vld [vmem:[#allocation2] sm:$0xff]  ;;  %v1400_v58 = vld [vmem:[#allocation2 + $0x8] sm:$0xff] }
 0x177   : > { %v1359_v2 = vmul.f32 %v3082_v22, %v1045_v55  ;;  %v1181_v29 = vmul.f32 %v3083_v26, %v929_v40  ;;  %v1278_v20 = vadd.f32 %v1262_v31, %v1182_v25  ;;  %v1376_v52 = vadd.f32 %v1360_v34, %v1280_v47 }
 0x178   : > { %v1358_v48 = vmul.f32 %v3084_v32, %v1042_v27  ;;  %v1357_v1 = vmul.f32 %v3085_v36, %v1037_v6  ;;  %v1386_v3 = vadd.s32 8, %v3087_v49  ;;  %v3090_v37 = vpack.c.bf16 %v3088_v45, %v3089_v18 }
 0x179   : > { %2118 = vmatpush3.bf16.msra.mxu1 %v1407_v54  ;;  %v1277_v63 = vadd.f32 %v1261_v42, %v1181_v29  ;;  %v1375_v13 = vadd.f32 %v1359_v2, %v1279_v8  ;;  %v1405_v30 = vpack.c.bf16 %v1377_v51, %v1376_v52  ;;  %vm1392_vm1 = vcmp.eq.s32.totalorder %v3087_v49, %v2013_v44 }
 0x17a   : > { %2119 = vmatprep.subr.bf16.mxu1 %v3071_v5  ;;  %v1374_v12 = vadd.f32 %v1358_v48, %v1278_v20  ;;  %vm1393_vm2 = vcmp.eq.s32.totalorder %v1386_v3, %v2013_v44  ;;  %v3093_v56 = vpack.c.bf16 %v3091_v35, %v3092_v4  ;;  %v2393_v15 = vmov 1.0|1.0  }
 0x17b   : > { %v1373_v14 = vadd.f32 %v1357_v1, %v1277_v63  ;;  %vm2016_vm3 = vmpackc.low %vm1393_vm2, %vm1392_vm1 }
 0x17c   : > { %v1404_v0 = vpack.c.bf16 %v1375_v13, %v1374_v12 }
 0x17d   : > { %2120 = vmatpush3.bf16.msra.mxu1 %v1406_v62  ;;  %v1403_v10 = vpack.c.bf16 %v1373_v14, %v3086_v53 }
 0x17e   : > { %2121 = vmatprep.subr.bf16.mxu1 %v3071_v5 }
 0x181   : > { %2122 = vmatpush3.bf16.msra.mxu1 %v1405_v30 }
 0x182   : > { %2123 = vmatprep.subr.bf16.mxu1 %v3071_v5 }
 0x185   : > { %2124 = vmatpush3.bf16.msra.mxu1 %v1404_v0 }
 0x186   : > { %2125 = vmatprep.subr.bf16.mxu1 %v3071_v5 }
 0x189   : > { %2126 = vmatpush3.bf16.msra.mxu1 %v1403_v10 }
 0x18a   : > { %2127 = vmatprep.subr.bf16.mxu1 %v3071_v5 }
 0x18d   : > { %2128 = vmatpush3.bf16.msra.mxu1 %v3090_v37 }
 0x18e   : > { %2129 = vmatprep.subr.bf16.mxu1 %v3071_v5 }
 0x191   : > { %2130 = vmatpush3.bf16.msra.mxu1 %v3093_v56 }
 0x194   : > { %2132 = vmatmul.mubr.msk.bf16.vlgmr.msra.gmra.mxu1 %vm2016_vm3, %v2393_v15 }
 0x254   : > { %v1443_v38 = vpop.f32.mrf.mxu1 }
 0x255   : > { %v1450_v16 = vadd.f32 %v1443_v38, %v1399_v21 }
 0x256   : > { %v2133_v60 = vpop.f32.mrf.mxu1 }
 0x257   : > { %1452 = vst [vmem:[#allocation2] sm:$0xff] %v1450_v16  ;;  %1457 = sbr.rel (%p2018_p3) target bundleno = 1632 (0x660), region = 76 }
 0x258   : > { %v1446_v19 = vpop.f32.mrf.mxu1 }
 0x259   : > { %v1451_v17 = vadd.f32 %v1446_v19, %v1400_v58 }
 0x25a   : > { %v2134_v50 = vpop.f32.mrf.mxu1 }
 0x25b   : > { %1453 = vst [vmem:[#allocation2 + $0x8] sm:$0xff] %v1451_v17 }
 0x25c   : > { %v1481_v5 = vld [vmem:[%s3013_s7] sm:$0xff]  ;;  %v2394_v23 = vmov 0   ;;  %v2395_v54 = vmov 0.0   ;;  %v1482_v59 = vld [vmem:[%s3013_s7 + $0x8] sm:$0xff]  ;;  %v1461_v55 = vstv %s1460_s26  ;;  %v3094_v47 = vlaneseq }
 0x25d   : > { %2306 = vset.pattern.permute.xlu1 %v2394_v23  ;;  %2135 = vmatprep.subr.mxu0 %v2395_v54  ;;  %v2019_v57 = vld [vmem:[%s3012_s6] ss:$0 sm:$0xff]  ;;  %vm1501_vm5 = vcmask 31744   ;;  %vm2396_vm7 = vmmov 0   ;;  %vm1529_vm9 = vcmask 130048   ;;  %vm1694_vm12 = vcmask 1043456  }
 0x25e   : > { %1484 = vperm.xlu1 %2306, %v1481_v5   ;;  %2142 = vmatprep.subr.mxu1 %v2395_v54  ;;  %v1458_v61 = vld [vmem:[#allocation2] sm:$0xff]  ;;  %v2938_v9 = vand.u32 127, %v3094_v47  ;;  %v2397_v19 = vmov 1966171168   ;;  %vm1849_vm13 = vcmask 1041409   ;;  %vm1851_vm14 = vcmask 1042434  }
 0x25f   : > { %2307 = vset.pattern.permute.xlu0 %v2394_v23  ;;  %v1462_v7 = vadd.f32 %v1461_v55, %v1458_v61  ;;  %v1684_v13 = vld [vmem:[%s3015_s9] sm:$0xf]  ;;  %2139 = vmatprep.mubr.msk.f32.mxu0 %vm2396_vm7, %v2395_v54  ;;  %v1774_v17 = vunpack.c.l.s4 %v2397_v19  ;;  %vm1853_vm15 = vcmask 1043459   ;;  %vm1856_vm0 = vcmask 60416  }
 0x260   : > { %2146 = vmatprep.mubr.msk.f32.mxu1 %vm2396_vm7, %v2395_v54  ;;  %v2020_v53 = vld [vmem:[%s3014_s8] ss:$0 sm:$0xff] }
 0x261   : > { %2308 = vtanh.f32 %v1462_v7  ;;  %v3095_v10 = vld [vmem:[#allocation27_spill] sm:$0xff]  ;;  %v1775_v50 = vunpack.c.0.s8 %v1774_v17 }
 0x262   : > { %v1459_v39 = vld [vmem:[#allocation2 + $0x8] sm:$0xff]  ;;  %1487 = vperm.xlu1 %2306, %v1482_v59   ;;  %vm1496_vm8 = vcmp.eq.s32.totalorder %v3095_v10, %v2020_v53  ;;  %v1768_v7 = vld [vmem:[%s3016_s10] sm:$0xff] }
 0x263   : > { %v1463_v43 = vadd.f32 %v1461_v55, %v1459_v39  ;;  %v2021_v45 = vsel %vm1496_vm8, 1.0, %v2395_v54  ;;  %v1778_v5 = vsub.s32 %v1775_v50, %v3095_v10 }
 0x265   : > { %2310 = vtanh.f32 %v1463_v43 }
 0x26e   : > { %v2309_v40 = vpop.eup %2308 }
 0x26f   : > { %v1473_v31 = vmul.f32 %v2309_v40, %v2019_v57 }
 0x271   : > { %1475 = vadd.xlane.f32.xlu0 %v1473_v31 }
 0x272   : > { %v2311_v28 = vpop.eup %2310 }
 0x273   : > { %v1474_v41 = vmul.f32 %v2311_v28, %v2019_v57  ;;  %v3096_v57 = vld [vmem:[#allocation29_spill] sm:$0xff] }
 0x275   : > { %1477 = vadd.xlane.f32.xlu0 %v1474_v41 }
 0x2d9   : > { %v1485_v46 = vpop.permute.xlu1 %1484 }
 0x2da   : > { %vm1489_vm4 = vcmp.eq.s32.totalorder %v2938_v9, %v1485_v46 }
 0x2db   : > { %v2022_v29 = vsel %vm1489_vm4, 1.0, %v2395_v54 }
 0x2dd   : > { %v1488_v11 = vpop.permute.xlu1 %1487 }
 0x2de   : > { %vm1490_vm6 = vcmp.eq.s32.totalorder %v2938_v9, %v1488_v11 }
 0x2df   : > { %v2023_v20 = vsel %vm1490_vm6, 1.0, %v2395_v54 }
 0x2fa   : > { %v1476_v27 = vpop.xlane.xlu0 %1475 }
 0x2fb   : > { %v1499_v34 = vsel %vm1489_vm4, %v1476_v27, -1e+30 }
 0x2fc   : > { %v1502_v24 = vsel %vm1501_vm5, %v1499_v34, -inf }
 0x2fe   : > { %v1478_v33 = vpop.xlane.xlu0 %1477 }
 0x2ff   : > { %v1500_v42 = vsel %vm1490_vm6, %v1478_v33, -1e+30 }
 0x300   : > { %v1503_v25 = vsel %vm1501_vm5, %v1500_v42, -inf  ;;  %v1771_v42 = vld [vmem:[%s3016_s10 + $0x18] sm:$0xff] }
 0x301   : > { %v1504_v8 = vmax.f32 %v1502_v24, %v1503_v25 }
 0x303   : > { %v1505_v51 = vrot.slane %v1504_v8, 4 }
 0x305   : > { %v1506_v62 = vmax.f32 %v1504_v8, %v1505_v51  ;;  %v1835_v8 = vsub.s32 %v2938_v9, %v3095_v10 }
 0x307   : > { %v1507_v6 = vrot.slane %v1506_v62, 2 }
 0x309   : > { %v1508_v22 = vmax.f32 %v1506_v62, %v1507_v6 }
 0x30b   : > { %v1509_v2 = vrot.slane %v1508_v22, 1 }
 0x30d   : > { %v1510_v26 = vmax.f32 %v1508_v22, %v1509_v2 }
 0x30f   : > { %v1516_v52 = vmul.f32 %v2023_v20, %v1510_v26  ;;  %v1515_v32 = vmul.f32 %v2022_v29, %v1510_v26 }
 0x311   : > { %v1520_v48 = vsel %vm1501_vm5, %v1516_v52, 0.0  ;;  %v1517_v63 = vsel %vm1501_vm5, %v1515_v32, 0.0 }
 0x312   : > { %1521 = vadd.xlane.f32.xlu0 %v1520_v48  ;;  %1518 = vadd.xlane.f32.xlu1 %v1517_v63 }
 0x323   : > { %1686 = vperm.xlu1 %2306, %v1684_v13  }
 0x39b   : > { %v1522_v30 = vpop.xlane.xlu0 %1521  ;;  %v1519_v36 = vpop.xlane.xlu1 %1518 }
 0x39c   : > { %v1524_v1 = vsub.f32 %v1478_v33, %v1522_v30  ;;  %v1523_v12 = vsub.f32 %v1476_v27, %v1519_v36  ;;  %v1770_v27 = vld [vmem:[%s3016_s10 + $0x10] sm:$0xff] }
 0x39e   : > { %v1527_v14 = vmul.f32 1.442695, %v1524_v1  ;;  %v1525_v0 = vmul.f32 1.442695, %v1523_v12 }
 0x39f   : > { %v1687_v38 = vpop.permute.xlu1 %1686 }
 0x3a0   : > { %2312 = vpow2.f32 %v1527_v14  ;;  %vm1688_vm11 = vcmp.eq.s32.totalorder %v2938_v9, %v1687_v38 }
 0x3a1   : > { %2314 = vpow2.f32 %v1525_v0  ;;  %v2026_v58 = vsel %vm1688_vm11, 1.0, %v2395_v54 }
 0x3ad   : > { %v2313_v49 = vpop.eup %2312 }
 0x3ae   : > { %v2315_v3 = vpop.eup %2314  ;;  %2136 = vmatpush3.msra.mxu0 %v2313_v49  ;;  %v1604_v44 = vmul.f32 %v2313_v49, %v2311_v28  ;;  %v1769_v28 = vld [vmem:[%s3016_s10 + $0x8] sm:$0xff] }
 0x3af   : > { %2137 = vmatprep.subr.mxu0 %v2395_v54  ;;  %v1603_v18 = vmul.f32 %v2315_v3, %v2309_v40 }
 0x3b0   : > { %2138 = vmatpush3.msra.mxu0 %v2315_v3  ;;  %2143 = vmatpush3.msra.mxu1 %v1604_v44 }
 0x3b1   : > { %2140 = vmatmul.mubr.msk.f32.vlgmr.msra.gmra.mxu0 %vm1529_vm9, %v2021_v45  ;;  %2144 = vmatprep.subr.mxu1 %v2395_v54 }
 0x3b2   : > { %2145 = vmatpush3.msra.mxu1 %v1603_v18  ;;  %2149 = vmatprep.subr.mxu0 %v2395_v54 }
 0x3b3   : > { %2147 = vmatmul.mubr.msk.f32.vlgmr.msra.gmra.mxu1 %vm1529_vm9, %v2021_v45  ;;  %2151 = vmatprep.mubr.msk.f32.mxu0 %vm2396_vm7, %v2395_v54 }
 0x471   : > { %v1599_v37 = vpop.f32.mrf.mxu0 }
 0x472   : > { %vm1675_vm10 = vcmp.gt.f32.partialorder %v1599_v37, 0.0 }
 0x473   : > { %v2141_v35 = vpop.f32.mrf.mxu0  ;;  %v1676_v4 = vsel %vm1675_vm10, %v1599_v37, 1.0  ;;  %v1671_v56 = vpop.f32.mrf.mxu1 }
 0x474   : > { %1679 = vperm.xlu0 %2307, %v1676_v4  }
 0x475   : > { %v2148_v15 = vpop.f32.mrf.mxu1 }
 0x4ef   : > { %v1680_v21 = vpop.permute.xlu0 %1679 }
 0x4f0   : > { %2316 = vrcp.f32 %v1680_v21 }
 0x4fd   : > { %v2317_v16 = vpop.eup %2316 }
 0x4fe   : > { %v1683_v60 = vmul.f32 %v2317_v16, %v1671_v56 }
 0x500   : > { %2150 = vmatpush3.msk.msra.mxu0 %vm1694_vm12, %v1683_v60 }
 0x501   : > { %2152 = vmatmul.mubr.msk.f32.vlgmr.msra.gmra.mxu0 %vm1501_vm5, %v2026_v58 }
 0x5c1   : > { %v1764_v23 = vpop.f32.mrf.mxu0 }
 0x5c2   : > { %v1779_v61 = vrot.slane %v1764_v23, %v1778_v5 }
 0x5c3   : > { %v2153_v39 = vpop.f32.mrf.mxu0 }
 0x5c4   : > { %v1780_v59 = vcombine.high %v1779_v61, %v1779_v61  ;;  %v1787_v55 = vrot.slane %v1779_v61, %v1778_v5 }
 0x5c6   : > { %v1794_v43 = vrot.slane %v1780_v59, %v1778_v5  ;;  %v1800_v54 = vrot.slane %v1787_v55, %v3096_v57  ;;  %v1795_v40 = vcombine.high %v1787_v55, %v1787_v55 }
 0x5c8   : > { %v1817_v31 = vmul.f32 %v1800_v54, %v1768_v7  ;;  %v1804_v41 = vrot.slane %v1794_v43, %v3096_v57  ;;  %v1808_v46 = vrot.slane %v1795_v40, %v3096_v57  ;;  %v1796_v47 = vcombine.high %v1794_v43, %v1794_v43 }
 0x5ca   : > { %1821 = vadd.xlane.f32.xlu0 %v1817_v31  ;;  %v1818_v11 = vmul.f32 %v1804_v41, %v1769_v28  ;;  %v1819_v34 = vmul.f32 %v1808_v46, %v1770_v27  ;;  %v1812_v33 = vrot.slane %v1796_v47, %v3096_v57 }
 0x5cc   : > { %1823 = vadd.xlane.f32.xlu1 %v1818_v11  ;;  %v1820_v24 = vmul.f32 %v1812_v33, %v1771_v42 }
 0x5ce   : > { %1825 = vadd.xlane.f32.xlu0 %v1819_v34 }
 0x5d2   : > { %1827 = vadd.xlane.f32.xlu0 %v1820_v24 }
 0x653   : > { %v1822_v25 = vpop.xlane.xlu0 %1821 }
 0x654   : > { %v1836_v22 = vrot.slane %v1822_v25, %v1835_v8 }
 0x655   : > { %v1824_v51 = vpop.xlane.xlu1 %1823 }
 0x656   : > { %v1840_v62 = vrot.slane %v1824_v51, %v1835_v8 }
 0x657   : > { %v1826_v6 = vpop.xlane.xlu0 %1825 }
 0x658   : > { %v1844_v2 = vrot.slane %v1826_v6, %v1835_v8  ;;  %v1850_v26 = vsel %vm1849_vm13, %v1840_v62, %v1836_v22 }
 0x65a   : > { %v1852_v52 = vsel %vm1851_vm14, %v1844_v2, %v1850_v26 }
 0x65b   : > { %v1828_v29 = vpop.xlane.xlu0 %1827 }
 0x65c   : > { %v1848_v20 = vrot.slane %v1828_v29, %v1835_v8 }
 0x65e   : > { %v1854_v32 = vsel %vm1853_vm15, %v1848_v20, %v1852_v52 }
 0x65f   : > { %1857 = vst.msk [vmem:[#allocation7] sm:$0xf] %vm1856_vm0, %v1854_v32 }
 0x660 PF: > { %p2168_p4 = scmp.eq.s32.totalorder %s2468_s20, 2  ;;  %s2398_s27 = smov [#allocation7]  }
 0x661   : > { %s1865_s28 = sshll.u32 %s2398_s27, 4  ;;  %s1866_s28 = int_to_ptr.vmem [resolvable:$true] %s1865_s28 }
 0x662   : > { %s2344_s29 = scalar_lea.vmem %s1866_s28, 64  ;;  %p2351_p8 = scmp.lt.s32.totalorder %s1866_s28, %s1866_s28 }
 0x663   : > { %p2345_p5 = scmp.ne.s32.totalorder %s1866_s28, %s2344_s29  ;;  %p2352_p9 = scmp.lt.s32.totalorder %s2344_s29, %s2344_s29 }
 0x665   : > { %p2346_p6 = pnand %p2345_p5, %p2168_p4  ;;  %p2353_p10 = por %p2352_p9, %p2351_p8 }
 0x667   : > { %p2347_p7 = pneg %p2346_p6 }
 0x669   : > { %p2354_p11 = pnand %p2353_p10, %p2347_p7 }
 0x66b   : > { %2357 = shalt.err (!%p2354_p11)
}
 0x66c   : > { %2159 = dma.vmem_to_hbm [thread:$0]  (%p2168_p4), %s1866_s28, 64, %s3017_s11, [#allocation6]  }
 0x66d   : > { %2377 = dma.done.wait (%p2168_p4), [#allocation6], 64  }
 0x66e   : > { %2379 = vsyncadd (%p2168_p4), [#allocation6], 4294967232 }
 0x66f PF: > { %s24_s19 = sadd.s32 1, %s2382_s19  }
 0x670   : > { %p21_p12 = scmp.ge.s32.totalorder %s24_s19, 5  }
 0x672   :  { %23 = sbr.rel (!%p21_p12) target bundleno = 4 (0x4), region = 110 }
 0x677   :  { %1878 = vsyncpa [#allocation5], 1 }
 0x678   :  { %1880 = vsyncpa [#allocation5 + $0x1], 1 }
 0x679   :  { %1881 = vsyncpa [#allocation6], 1 }
 0x67a   :  { %1883 = vsyncpa [#allocation6 + $0x1], 1 }

</bundles_post_ra>
